<compile_context>
chip_gen: v6e
topology: v6e:2x2x1
jax: 0.10.0
libtpu: 0.0.40
codegen_flags: <defaults>
</compile_context>

<pallas_src>
import functools

import jax
import jax.numpy as jnp
from jax import lax
from jax.experimental import pallas as pl
from jax.experimental.pallas import tpu as pltpu


def _sgc_maml_kernel(x_ref, y_ref, w_ref, losses_ref, corrects_ref, *,
                     lr, local_ep, users_per_block, total_users,
                     n_support, n_query, acc_rows):
    """One grid step == up to `users_per_block` users' full MAML inner loops."""
    c_idx = pl.program_id(0)        # leading "parallel" axis (megacore split)
    g_idx = pl.program_id(1)        # "arbitrary" axis: user blocks, resident acc
    E = local_ep
    n_total = n_support + n_query

    @pl.when(g_idx == 0)
    def _():
        losses_ref[...] = jnp.zeros_like(losses_ref)
        corrects_ref[...] = jnp.zeros_like(corrects_ref)

    w0 = w_ref[...]                                # [C, F] f32 meta weights
    num_c = w0.shape[0]
    w0_b = w0.astype(jnp.bfloat16)                 # cast once per grid step

    # Loop-invariant index helpers (hoisted: JAX does not CSE broadcasts).
    cls = lax.broadcasted_iota(jnp.int32, (num_c, n_total), 0)    # class ids
    cls_f = cls.astype(jnp.float32)
    col = lax.broadcasted_iota(jnp.int32, (1, n_total), 1)        # column ids
    q_mask = (col >= n_support).astype(jnp.float32)               # query cols
    row = lax.broadcasted_iota(jnp.int32, (acc_rows, 128), 0)     # output rows

    inv_nq = 1.0 / n_query
    inv_ns = 1.0 / n_support

    # Only the valid users of this block run; padded users are skipped.
    u_base = (c_idx * pl.num_programs(1) + g_idx) * users_per_block
    n_valid = jnp.maximum(jnp.minimum(users_per_block, total_users - u_base), 0)

    @pl.loop(0, n_valid)
    def _(b):
        x_b = x_ref[b]                             # [Ns+Nq, F] bf16 (support|query)
        y_row = y_ref[b]                           # [1, Ns+Nq] int32
        y_f = y_row.astype(jnp.float32)
        onehot = (cls == y_row).astype(jnp.float32)        # [C, Ns+Nq]

        w = w0                                     # fast weights, f32 registers
        w_b = w0_b
        step_loss = []
        step_acc = []
        for k in range(E + 1):                     # unrolled: E small & static
            # One fused logits matmul per fast weight: [C, Ns+Nq] f32.
            lg = lax.dot_general(w_b, x_b, (((1,), (1,)), ((), ())),
                                 preferred_element_type=jnp.float32)
            m = jnp.max(lg, axis=0, keepdims=True)         # [1, Ns+Nq]
            z = lg - m
            ez = jnp.exp(z)
            s = jnp.sum(ez, axis=0, keepdims=True)         # [1, Ns+Nq]
            lse = jnp.log(s)
            zy = jnp.sum(onehot * z, axis=0, keepdims=True)

            # Query-column CE loss and accuracy (first-argmax = torch argmax).
            step_loss.append(jnp.sum(q_mask * (lse - zy)) * inv_nq)
            is_max = lg >= m
            pred = jnp.min(jnp.where(is_max, cls_f, float(num_c)),
                           axis=0, keepdims=True)
            step_acc.append(
                jnp.sum(q_mask * (pred == y_f).astype(jnp.float32)) * inv_nq)

            if k < E:
                # Support-column closed-form d(mean CE)/dW; exact division kept
                # for parity with the f32 softmax of the reference.
                p = ez / s                                  # [C, Ns+Nq]
                d = (p - onehot)[:, :n_support] * inv_ns    # origin lane slice
                grad = lax.dot_general(
                    d.astype(jnp.bfloat16), x_b[:n_support, :],
                    (((1,), (0,)), ((), ())),
                    preferred_element_type=jnp.float32)     # [C, F]
                w = w - lr * grad
                w_b = w.astype(jnp.bfloat16)                # cast once, reused

        # Scatter the E+1 per-step scalars onto output sublanes and do one
        # unmasked full-tile add per output for this user.
        l_upd = jnp.zeros((acc_rows, 128), jnp.float32)
        c_upd = jnp.zeros((acc_rows, 128), jnp.float32)
        for k in range(E + 1):
            sel = row == k
            l_upd = jnp.where(sel, step_loss[k], l_upd)
            c_upd = jnp.where(sel, step_acc[k], c_upd)
        losses_ref[...] = losses_ref[...] + l_upd
        corrects_ref[...] = corrects_ref[...] + c_upd


def local_update_sgc_forward(W, xs, ys, xq, yq, *, lr, local_ep,
                             users_per_block=2, core_splits=1):
    """W: [C, F]; xs/xq: [U, Ns/Nq, F]; ys/yq: [U, Ns/Nq] integer labels.

    Returns (W, mean_loss, losses_q, corrects_q).  losses_q[k] / corrects_q[k]
    are the query loss / per-user mean accuracy at inner step k summed over
    users (matching the torch loop; multiply corrects by Nq for raw counts);
    mean_loss = sum(losses_q) / (local_ep + 1) exactly as the torch return.

    users_per_block: raise toward 4-8 on v6e/v5e (128 MiB VMEM) when blocks
    fit; keep small (1-2) on v7x (64 MiB VMEM).  core_splits: 1 on v5e/v6e,
    2 on v7x (two TensorCores).
    """
    U, Ns, F = xs.shape
    _, Nq, _ = xq.shape
    C = W.shape[0]
    E = int(local_ep)
    blk = int(users_per_block)
    nsplit = int(core_splits)
    n_total = Ns + Nq

    G = pl.cdiv(U, blk * nsplit)                  # user blocks per core split
    padded_u = G * blk * nsplit
    R = ((E + 1 + 7) // 8) * 8                    # sublane-padded accumulator rows

    # One fused [support|query] bf16 feature slab + one int32 label row per
    # user: 2 HBM streams instead of 4.  Pick blk*nsplit to divide U so the
    # pad concat below is a no-op (padded users are skipped at runtime anyway).
    x_all = jnp.concatenate([xs, xq], axis=1).astype(jnp.bfloat16)   # [U,Nt,F]
    y_all = jnp.concatenate([ys.astype(jnp.int32), yq.astype(jnp.int32)],
                            axis=1).reshape(U, 1, n_total)
    if padded_u != U:
        pad = padded_u - U
        x_all = jnp.concatenate(
            [x_all, jnp.zeros((pad, n_total, F), x_all.dtype)], axis=0)
        y_all = jnp.concatenate(
            [y_all, jnp.zeros((pad, 1, n_total), y_all.dtype)], axis=0)
    w_f32 = W.astype(jnp.float32)

    kernel = functools.partial(
        _sgc_maml_kernel, lr=float(lr), local_ep=E, users_per_block=blk,
        total_users=U, n_support=Ns, n_query=Nq, acc_rows=R)

    # Explicit VMEM budget: double-buffered feature+label blocks, the
    # grid-invariant weight, and the resident output tiles, with headroom.
    block_bytes = blk * (n_total * F * 2 + n_total * 4)
    est = 2 * block_bytes + 2 * C * F * 4 + 2 * 2 * R * 128 * 4
    vmem_limit = int(min(max(4 * est, 32 << 20), 64 << 20))

    cost = pl.CostEstimate(
        flops=int(U * ((E + 1) * 2 * C * n_total * F + E * 2 * C * F * Ns)),
        transcendentals=int(U * (E + 1) * (C + 2) * n_total),
        bytes_accessed=int(U * (n_total * F * 2 + n_total * 4) + C * F * 4
                           + 2 * nsplit * R * 128 * 4))

    losses, corrects = pl.pallas_call(
        kernel,
        out_shape=(jax.ShapeDtypeStruct((nsplit, R, 128), jnp.float32),
                   jax.ShapeDtypeStruct((nsplit, R, 128), jnp.float32)),
        grid_spec=pltpu.PrefetchScalarGridSpec(
            num_scalar_prefetch=0,
            grid=(nsplit, G),
            in_specs=[
                pl.BlockSpec((blk, n_total, F), lambda c, g: (c * G + g, 0, 0)),
                pl.BlockSpec((blk, 1, n_total), lambda c, g: (c * G + g, 0, 0)),
                pl.BlockSpec((C, F), lambda c, g: (0, 0)),   # grid-invariant W
            ],
            out_specs=[
                pl.BlockSpec((None, R, 128), lambda c, g: (c, 0, 0)),
                pl.BlockSpec((None, R, 128), lambda c, g: (c, 0, 0)),
            ],
        ),
        compiler_params=pltpu.CompilerParams(
            dimension_semantics=("parallel", "arbitrary"),
            vmem_limit_bytes=vmem_limit),
        cost_estimate=cost,
    )(x_all, y_all, w_f32)

    losses_q = jnp.sum(losses[:, :E + 1, 0], axis=0)          # [E+1]
    corrects_q = jnp.sum(corrects[:, :E + 1, 0], axis=0)      # [E+1]
    mean_loss = jnp.sum(losses_q) / (E + 1)
    # TODO(synk): Adam meta-update on W not performed; weights returned as-is.
    return W, mean_loss, losses_q, corrects_q


def _reference(W, xs, ys, xq, yq, lr, E):
    """Pure-JAX reference with the same mixed-precision recipe as the kernel
    (bf16 MXU operands, f32 accumulation / softmax / CE / weight updates)."""
    C = W.shape[0]

    def mm(a, b, dims):
        return lax.dot_general(a.astype(jnp.bfloat16), b.astype(jnp.bfloat16),
                               dims, preferred_element_type=jnp.float32)

    def logits(w, x):                                        # [N, C]
        return mm(x, w, (((1,), (1,)), ((), ())))

    def ce(lg, y):
        logp = jax.nn.log_softmax(lg, -1)
        return -jnp.mean(jnp.take_along_axis(logp, y[:, None], axis=-1))

    def acc(lg, y):
        return jnp.mean((jnp.argmax(lg, -1) == y).astype(jnp.float32))

    def grad(w, x, y):
        lg = logits(w, x)
        p = jax.nn.softmax(lg, -1)
        d = (p - jax.nn.one_hot(y, C, dtype=jnp.float32)) / x.shape[0]
        return mm(d, x, (((0,), (0,)), ((), ())))            # [C, F]

    U = xs.shape[0]
    losses = jnp.zeros(E + 1, jnp.float32)
    accs = jnp.zeros(E + 1, jnp.float32)
    for u in range(U):
        w = W.astype(jnp.float32)
        lg = logits(w, xq[u])
        losses = losses.at[0].add(ce(lg, yq[u]))
        accs = accs.at[0].add(acc(lg, yq[u]))
        for k in range(E):
            w = w - lr * grad(w, xs[u], ys[u])
            lg = logits(w, xq[u])
            losses = losses.at[k + 1].add(ce(lg, yq[u]))
            accs = accs.at[k + 1].add(acc(lg, yq[u]))
    return losses, accs


if __name__ == "__main__":
    key = jax.random.PRNGKey(0)
    k1, k2, k3, k4, k5 = jax.random.split(key, 5)

    U, Ns, Nq, F, C = 4, 8, 8, 32, 8    # users, support, query, features, classes
    local_ep = 3
    lr = 0.05

    xs = jax.random.normal(k1, (U, Ns, F), jnp.float32)
    xq = jax.random.normal(k2, (U, Nq, F), jnp.float32)
    ys = jax.random.randint(k3, (U, Ns), 0, C, dtype=jnp.int32)
    yq = jax.random.randint(k4, (U, Nq), 0, C, dtype=jnp.int32)
    # SGC model parameter: a single linear weight vars[0] of shape [C, F].
    W = 0.1 * jax.random.normal(k5, (C, F), jnp.float32)

    ref_losses, ref_accs = _reference(W, xs, ys, xq, yq, lr, local_ep)

    # Primary config: blk * core_splits divides U (no padding, no pad copies).
    W_out, mean_loss, losses_q, corrects_q = local_update_sgc_forward(
        W, xs, ys, xq, yq, lr=lr, local_ep=local_ep,
        users_per_block=2, core_splits=1)
    jax.block_until_ready((W_out, mean_loss, losses_q, corrects_q))

    assert jnp.allclose(losses_q, ref_losses, atol=1e-4, rtol=1e-4), (
        losses_q, ref_losses)
    assert jnp.allclose(corrects_q, ref_accs, atol=1e-4, rtol=1e-4), (
        corrects_q, ref_accs)
    assert jnp.allclose(mean_loss, jnp.sum(ref_losses) / (local_ep + 1),
                        atol=1e-4, rtol=1e-4)

    # Padded config: exercises the runtime skip of padded users (blk=3, U=4).
    _, _, losses_p, corrects_p = local_update_sgc_forward(
        W, xs, ys, xq, yq, lr=lr, local_ep=local_ep,
        users_per_block=3, core_splits=1)
    jax.block_until_ready((losses_p, corrects_p))
    assert jnp.allclose(losses_p, ref_losses, atol=1e-4, rtol=1e-4), (
        losses_p, ref_losses)
    assert jnp.allclose(corrects_p, ref_accs, atol=1e-4, rtol=1e-4), (
        corrects_p, ref_accs)

    print("KERNEL_OK")
</pallas_src>

<mosaic_0001>
module attributes {stable_mosaic.version = 11 : i64} {
  func.func @_sgc_maml_kernel(%arg0: i32, %arg1: i32, %arg2: memref<2x16x32xbf16, #tpu.memory_space<vmem>>, %arg3: memref<2x1x16xi32, #tpu.memory_space<vmem>>, %arg4: memref<8x32xf32, #tpu.memory_space<vmem>>, %arg5: memref<1x8x128xf32, #tpu.memory_space<vmem>>, %arg6: memref<1x8x128xf32, #tpu.memory_space<vmem>>) attributes {dimension_semantics = [#tpu.dimension_semantics<parallel>, #tpu.dimension_semantics<arbitrary>], iteration_bounds = array<i64: 1, 2>, scalar_prefetch = 0 : i64, scratch_operands = 0 : i64, tpu.core_type = #tpu.core_type<tc>, window_params = [{transform_indices = @transform_0, window_bounds = array<i64: 2, 16, 32>}, {transform_indices = @transform_1, window_bounds = array<i64: 2, 1, 16>}, {pipeline_mode = #tpu.pipeline_mode<synchronous>, transform_indices = @transform_2, window_bounds = array<i64: 8, 32>}, {transform_indices = @transform_3, window_bounds = array<i64: 1, 8, 128>}, {transform_indices = @transform_4, window_bounds = array<i64: 1, 8, 128>}]} {
    %c0_i32 = arith.constant 0 : i32
    %0 = arith.cmpi eq, %arg1, %c0_i32 : i32
    %1 = arith.extui %0 : i1 to i32
    %c0_i32_0 = arith.constant 0 : i32
    %2 = arith.cmpi ne, %1, %c0_i32_0 : i32
    scf.if %2 {
      %cst = arith.constant 0.000000e+00 : f32
      %25 = vector.broadcast %cst : f32 to vector<8x128xf32>
      %c0_12 = arith.constant 0 : index
      %c0_13 = arith.constant 0 : index
      %c0_14 = arith.constant 0 : index
      %26 = vector.load %arg5[%c0_12, %c0_13, %c0_14] : memref<1x8x128xf32, #tpu.memory_space<vmem>>, vector<1x8x128xf32>
      %27 = vector.shape_cast %26 : vector<1x8x128xf32> to vector<8x128xf32>
      %28 = vector.shape_cast %25 : vector<8x128xf32> to vector<1x8x128xf32>
      tpu.vector_store %arg5[%c0_12, %c0_13, %c0_14], %28 {strides = array<i32>} : memref<1x8x128xf32, #tpu.memory_space<vmem>>, vector<1x8x128xf32>,
      %cst_15 = arith.constant 0.000000e+00 : f32
      %29 = vector.broadcast %cst_15 : f32 to vector<8x128xf32>
      %c0_16 = arith.constant 0 : index
      %c0_17 = arith.constant 0 : index
      %c0_18 = arith.constant 0 : index
      %30 = vector.load %arg6[%c0_16, %c0_17, %c0_18] : memref<1x8x128xf32, #tpu.memory_space<vmem>>, vector<1x8x128xf32>
      %31 = vector.shape_cast %30 : vector<1x8x128xf32> to vector<8x128xf32>
      %32 = vector.shape_cast %29 : vector<8x128xf32> to vector<1x8x128xf32>
      tpu.vector_store %arg6[%c0_16, %c0_17, %c0_18], %32 {strides = array<i32>} : memref<1x8x128xf32, #tpu.memory_space<vmem>>, vector<1x8x128xf32>,
    } else {
    }
    %c0 = arith.constant 0 : index
    %c0_1 = arith.constant 0 : index
    %3 = vector.load %arg4[%c0, %c0_1] : memref<8x32xf32, #tpu.memory_space<vmem>>, vector<8x32xf32>
    %4 = arith.truncf %3 : vector<8x32xf32> to vector<8x32xbf16>
    %5 = tpu.iota {dimensions = array<i32: 0>} : vector<8x16xi32>
    %6 = arith.sitofp %5 : vector<8x16xi32> to vector<8x16xf32>
    %7 = tpu.iota {dimensions = array<i32: 1>} : vector<1x16xi32>
    %c8_i32 = arith.constant 8 : i32
    %8 = vector.broadcast %c8_i32 : i32 to vector<1x16xi32>
    %9 = arith.cmpi sge, %7, %8 : vector<1x16xi32>
    %10 = arith.extui %9 : vector<1x16xi1> to vector<1x16xi32>
    %11 = arith.sitofp %10 : vector<1x16xi32> to vector<1x16xf32>
    %12 = tpu.iota {dimensions = array<i32: 0>} : vector<8x128xi32>
    %c2_i32 = arith.constant 2 : i32
    %13 = arith.muli %arg0, %c2_i32 : i32
    %14 = arith.addi %13, %arg1 : i32
    %c2_i32_2 = arith.constant 2 : i32
    %15 = arith.muli %14, %c2_i32_2 : i32
    %c4_i32 = arith.constant 4 : i32
    %16 = arith.subi %c4_i32, %15 : i32
    %c2_i32_3 = arith.constant 2 : i32
    %17 = arith.minsi %c2_i32_3, %16 : i32
    %c0_i32_4 = arith.constant 0 : i32
    %18 = arith.maxsi %17, %c0_i32_4 : i32
    %c0_i32_5 = arith.constant 0 : i32
    %19 = arith.subi %18, %c0_i32_5 : i32
    %c1_i32 = arith.constant 1 : i32
    %c1_i32_6 = arith.constant 1 : i32
    %20 = arith.subi %c1_i32, %c1_i32_6 : i32
    %21 = arith.addi %19, %20 : i32
    %c1_i32_7 = arith.constant 1 : i32
    %22 = arith.divsi %21, %c1_i32_7 : i32
    %c1_i32_8 = arith.constant 1 : i32
    %c0_i32_9 = arith.constant 0 : i32
    %c0_i32_10 = arith.constant 0 : i32
    %23 = arith.subi %22, %c0_i32_10 : i32
    %24 = arith.addi %c0_i32_10, %23 : i32
    %c1_i32_11 = arith.constant 1 : i32
    scf.for %arg7 = %c0_i32_10 to %24 step %c1_i32_11  : i32 {
      %25 = arith.muli %arg7, %c1_i32_8 : i32
      %26 = arith.addi %c0_i32_9, %25 : i32
      %27 = arith.index_cast %26 : i32 to index
      %c0_12 = arith.constant 0 : index
      %c0_13 = arith.constant 0 : index
      %28 = vector.load %arg2[%27, %c0_12, %c0_13] : memref<2x16x32xbf16, #tpu.memory_space<vmem>>, vector<1x16x32xbf16>
      %29 = vector.shape_cast %28 : vector<1x16x32xbf16> to vector<16x32xbf16>
      %30 = arith.index_cast %26 : i32 to index
      %c0_14 = arith.constant 0 : index
      %c0_15 = arith.constant 0 : index
      %31 = vector.load %arg3[%30, %c0_14, %c0_15] : memref<2x1x16xi32, #tpu.memory_space<vmem>>, vector<1x1x16xi32>
      %32 = vector.shape_cast %31 : vector<1x1x16xi32> to vector<1x16xi32>
      %33 = arith.sitofp %32 : vector<1x16xi32> to vector<1x16xf32>
      %34 = vector.broadcast %32 : vector<1x16xi32> to vector<8x16xi32>
      %35 = arith.cmpi eq, %5, %34 : vector<8x16xi32>
      %36 = arith.extui %35 : vector<8x16xi1> to vector<8x16xi32>
      %37 = arith.sitofp %36 : vector<8x16xi32> to vector<8x16xf32>
      %cst = arith.constant dense<0.000000e+00> : vector<8x16xf32>
      %38 = tpu.matmul %4, %29, %cst {dimension_numbers = #tpu.dot_dimension_numbers<[1], [1], [0], [0], [0, 0, 1, 0], [], []>} : vector<8x32xbf16>, vector<16x32xbf16>, vector<8x16xf32> -> vector<8x16xf32>
      %cst_16 = arith.constant dense<0xFF800000> : vector<16xf32>
      %39 = vector.multi_reduction <maximumf>, %38, %cst_16 [0] : vector<8x16xf32> to vector<16xf32>
      %40 = vector.shape_cast %39 : vector<16xf32> to vector<1x16xf32>
      %41 = vector.broadcast %40 : vector<1x16xf32> to vector<8x16xf32>
      %42 = arith.subf %38, %41 : vector<8x16xf32>
      %43 = math.exp %42 : vector<8x16xf32>
      %cst_17 = arith.constant dense<0.000000e+00> : vector<16xf32>
      %44 = vector.multi_reduction <add>, %43, %cst_17 [0] : vector<8x16xf32> to vector<16xf32>
      %45 = vector.shape_cast %44 : vector<16xf32> to vector<1x16xf32>
      %46 = math.log %45 : vector<1x16xf32>
      %47 = arith.mulf %37, %42 : vector<8x16xf32>
      %cst_18 = arith.constant dense<0.000000e+00> : vector<16xf32>
      %48 = vector.multi_reduction <add>, %47, %cst_18 [0] : vector<8x16xf32> to vector<16xf32>
      %49 = vector.shape_cast %48 : vector<16xf32> to vector<1x16xf32>
      %50 = arith.subf %46, %49 : vector<1x16xf32>
      %51 = arith.mulf %11, %50 : vector<1x16xf32>
      %52 = vector.shape_cast %51 : vector<1x16xf32> to vector<1x1x16xf32>
      %cst_19 = arith.constant dense<0.000000e+00> : vector<1xf32>
      %53 = vector.multi_reduction <add>, %52, %cst_19 [1, 2] : vector<1x1x16xf32> to vector<1xf32>
      %54 = vector.shape_cast %53 : vector<1xf32> to vector<1x1x1xf32>
      %55 = vector.extract %54[0, 0, 0] : f32 from vector<1x1x1xf32>
      %cst_20 = arith.constant 1.250000e-01 : f32
      %56 = arith.mulf %55, %cst_20 : f32
      %57 = vector.broadcast %40 : vector<1x16xf32> to vector<8x16xf32>
      %58 = arith.cmpf oge, %38, %57 : vector<8x16xf32>
      %cst_21 = arith.constant 8.000000e+00 : f32
      %59 = vector.broadcast %cst_21 : f32 to vector<8x16xf32>
      %60 = arith.select %58, %6, %59 : vector<8x16xi1>, vector<8x16xf32>
      %cst_22 = arith.constant dense<0x7F800000> : vector<16xf32>
      %61 = vector.multi_reduction <minimumf>, %60, %cst_22 [0] : vector<8x16xf32> to vector<16xf32>
      %62 = vector.shape_cast %61 : vector<16xf32> to vector<1x16xf32>
      %63 = arith.cmpf oeq, %62, %33 : vector<1x16xf32>
      %64 = arith.extui %63 : vector<1x16xi1> to vector<1x16xi32>
      %65 = arith.sitofp %64 : vector<1x16xi32> to vector<1x16xf32>
      %66 = arith.mulf %11, %65 : vector<1x16xf32>
      %67 = vector.shape_cast %66 : vector<1x16xf32> to vector<1x1x16xf32>
      %cst_23 = arith.constant dense<0.000000e+00> : vector<1xf32>
      %68 = vector.multi_reduction <add>, %67, %cst_23 [1, 2] : vector<1x1x16xf32> to vector<1xf32>
      %69 = vector.shape_cast %68 : vector<1xf32> to vector<1x1x1xf32>
      %70 = vector.extract %69[0, 0, 0] : f32 from vector<1x1x1xf32>
      %cst_24 = arith.constant 1.250000e-01 : f32
      %71 = arith.mulf %70, %cst_24 : f32
      %72 = vector.broadcast %45 : vector<1x16xf32> to vector<8x16xf32>
      %73 = arith.divf %43, %72 : vector<8x16xf32>
      %74 = arith.subf %73, %37 : vector<8x16xf32>
      %75 = vector.extract_strided_slice %74 {offsets = [0, 0], sizes = [8, 8], strides = [1, 1]} : vector<8x16xf32> to vector<8x8xf32>
      %cst_25 = arith.constant 1.250000e-01 : f32
      %76 = vector.broadcast %cst_25 : f32 to vector<8x8xf32>
      %77 = arith.mulf %75, %76 : vector<8x8xf32>
      %78 = arith.truncf %77 : vector<8x8xf32> to vector<8x8xbf16>
      %79 = vector.extract_strided_slice %29 {offsets = [0, 0], sizes = [8, 32], strides = [1, 1]} : vector<16x32xbf16> to vector<8x32xbf16>
      %cst_26 = arith.constant dense<0.000000e+00> : vector<8x32xf32>
      %80 = tpu.matmul %78, %79, %cst_26 {dimension_numbers = #tpu.dot_dimension_numbers<[1], [0], [0], [1], [0, 0, 1, 1], [], []>} : vector<8x8xbf16>, vector<8x32xbf16>, vector<8x32xf32> -> vector<8x32xf32>
      %cst_27 = arith.constant 5.000000e-02 : f32
      %81 = vector.broadcast %cst_27 : f32 to vector<8x32xf32>
      %82 = arith.mulf %81, %80 : vector<8x32xf32>
      %83 = arith.subf %3, %82 : vector<8x32xf32>
      %84 = arith.truncf %83 : vector<8x32xf32> to vector<8x32xbf16>
      %cst_28 = arith.constant dense<0.000000e+00> : vector<8x16xf32>
      %85 = tpu.matmul %84, %29, %cst_28 {dimension_numbers = #tpu.dot_dimension_numbers<[1], [1], [0], [0], [0, 0, 1, 0], [], []>} : vector<8x32xbf16>, vector<16x32xbf16>, vector<8x16xf32> -> vector<8x16xf32>
      %cst_29 = arith.constant dense<0xFF800000> : vector<16xf32>
      %86 = vector.multi_reduction <maximumf>, %85, %cst_29 [0] : vector<8x16xf32> to vector<16xf32>
      %87 = vector.shape_cast %86 : vector<16xf32> to vector<1x16xf32>
      %88 = vector.broadcast %87 : vector<1x16xf32> to vector<8x16xf32>
      %89 = arith.subf %85, %88 : vector<8x16xf32>
      %90 = math.exp %89 : vector<8x16xf32>
      %cst_30 = arith.constant dense<0.000000e+00> : vector<16xf32>
      %91 = vector.multi_reduction <add>, %90, %cst_30 [0] : vector<8x16xf32> to vector<16xf32>
      %92 = vector.shape_cast %91 : vector<16xf32> to vector<1x16xf32>
      %93 = math.log %92 : vector<1x16xf32>
      %94 = arith.mulf %37, %89 : vector<8x16xf32>
      %cst_31 = arith.constant dense<0.000000e+00> : vector<16xf32>
      %95 = vector.multi_reduction <add>, %94, %cst_31 [0] : vector<8x16xf32> to vector<16xf32>
      %96 = vector.shape_cast %95 : vector<16xf32> to vector<1x16xf32>
      %97 = arith.subf %93, %96 : vector<1x16xf32>
      %98 = arith.mulf %11, %97 : vector<1x16xf32>
      %99 = vector.shape_cast %98 : vector<1x16xf32> to vector<1x1x16xf32>
      %cst_32 = arith.constant dense<0.000000e+00> : vector<1xf32>
      %100 = vector.multi_reduction <add>, %99, %cst_32 [1, 2] : vector<1x1x16xf32> to vector<1xf32>
      %101 = vector.shape_cast %100 : vector<1xf32> to vector<1x1x1xf32>
      %102 = vector.extract %101[0, 0, 0] : f32 from vector<1x1x1xf32>
      %cst_33 = arith.constant 1.250000e-01 : f32
      %103 = arith.mulf %102, %cst_33 : f32
      %104 = vector.broadcast %87 : vector<1x16xf32> to vector<8x16xf32>
      %105 = arith.cmpf oge, %85, %104 : vector<8x16xf32>
      %cst_34 = arith.constant 8.000000e+00 : f32
      %106 = vector.broadcast %cst_34 : f32 to vector<8x16xf32>
      %107 = arith.select %105, %6, %106 : vector<8x16xi1>, vector<8x16xf32>
      %cst_35 = arith.constant dense<0x7F800000> : vector<16xf32>
      %108 = vector.multi_reduction <minimumf>, %107, %cst_35 [0] : vector<8x16xf32> to vector<16xf32>
      %109 = vector.shape_cast %108 : vector<16xf32> to vector<1x16xf32>
      %110 = arith.cmpf oeq, %109, %33 : vector<1x16xf32>
      %111 = arith.extui %110 : vector<1x16xi1> to vector<1x16xi32>
      %112 = arith.sitofp %111 : vector<1x16xi32> to vector<1x16xf32>
      %113 = arith.mulf %11, %112 : vector<1x16xf32>
      %114 = vector.shape_cast %113 : vector<1x16xf32> to vector<1x1x16xf32>
      %cst_36 = arith.constant dense<0.000000e+00> : vector<1xf32>
      %115 = vector.multi_reduction <add>, %114, %cst_36 [1, 2] : vector<1x1x16xf32> to vector<1xf32>
      %116 = vector.shape_cast %115 : vector<1xf32> to vector<1x1x1xf32>
      %117 = vector.extract %116[0, 0, 0] : f32 from vector<1x1x1xf32>
      %cst_37 = arith.constant 1.250000e-01 : f32
      %118 = arith.mulf %117, %cst_37 : f32
      %119 = vector.broadcast %92 : vector<1x16xf32> to vector<8x16xf32>
      %120 = arith.divf %90, %119 : vector<8x16xf32>
      %121 = arith.subf %120, %37 : vector<8x16xf32>
      %122 = vector.extract_strided_slice %121 {offsets = [0, 0], sizes = [8, 8], strides = [1, 1]} : vector<8x16xf32> to vector<8x8xf32>
      %cst_38 = arith.constant 1.250000e-01 : f32
      %123 = vector.broadcast %cst_38 : f32 to vector<8x8xf32>
      %124 = arith.mulf %122, %123 : vector<8x8xf32>
      %125 = arith.truncf %124 : vector<8x8xf32> to vector<8x8xbf16>
      %126 = vector.extract_strided_slice %29 {offsets = [0, 0], sizes = [8, 32], strides = [1, 1]} : vector<16x32xbf16> to vector<8x32xbf16>
      %cst_39 = arith.constant dense<0.000000e+00> : vector<8x32xf32>
      %127 = tpu.matmul %125, %126, %cst_39 {dimension_numbers = #tpu.dot_dimension_numbers<[1], [0], [0], [1], [0, 0, 1, 1], [], []>} : vector<8x8xbf16>, vector<8x32xbf16>, vector<8x32xf32> -> vector<8x32xf32>
      %cst_40 = arith.constant 5.000000e-02 : f32
      %128 = vector.broadcast %cst_40 : f32 to vector<8x32xf32>
      %129 = arith.mulf %128, %127 : vector<8x32xf32>
      %130 = arith.subf %83, %129 : vector<8x32xf32>
      %131 = arith.truncf %130 : vector<8x32xf32> to vector<8x32xbf16>
      %cst_41 = arith.constant dense<0.000000e+00> : vector<8x16xf32>
      %132 = tpu.matmul %131, %29, %cst_41 {dimension_numbers = #tpu.dot_dimension_numbers<[1], [1], [0], [0], [0, 0, 1, 0], [], []>} : vector<8x32xbf16>, vector<16x32xbf16>, vector<8x16xf32> -> vector<8x16xf32>
      %cst_42 = arith.constant dense<0xFF800000> : vector<16xf32>
      %133 = vector.multi_reduction <maximumf>, %132, %cst_42 [0] : vector<8x16xf32> to vector<16xf32>
      %134 = vector.shape_cast %133 : vector<16xf32> to vector<1x16xf32>
      %135 = vector.broadcast %134 : vector<1x16xf32> to vector<8x16xf32>
      %136 = arith.subf %132, %135 : vector<8x16xf32>
      %137 = math.exp %136 : vector<8x16xf32>
      %cst_43 = arith.constant dense<0.000000e+00> : vector<16xf32>
      %138 = vector.multi_reduction <add>, %137, %cst_43 [0] : vector<8x16xf32> to vector<16xf32>
      %139 = vector.shape_cast %138 : vector<16xf32> to vector<1x16xf32>
      %140 = math.log %139 : vector<1x16xf32>
      %141 = arith.mulf %37, %136 : vector<8x16xf32>
      %cst_44 = arith.constant dense<0.000000e+00> : vector<16xf32>
      %142 = vector.multi_reduction <add>, %141, %cst_44 [0] : vector<8x16xf32> to vector<16xf32>
      %143 = vector.shape_cast %142 : vector<16xf32> to vector<1x16xf32>
      %144 = arith.subf %140, %143 : vector<1x16xf32>
      %145 = arith.mulf %11, %144 : vector<1x16xf32>
      %146 = vector.shape_cast %145 : vector<1x16xf32> to vector<1x1x16xf32>
      %cst_45 = arith.constant dense<0.000000e+00> : vector<1xf32>
      %147 = vector.multi_reduction <add>, %146, %cst_45 [1, 2] : vector<1x1x16xf32> to vector<1xf32>
      %148 = vector.shape_cast %147 : vector<1xf32> to vector<1x1x1xf32>
      %149 = vector.extract %148[0, 0, 0] : f32 from vector<1x1x1xf32>
      %cst_46 = arith.constant 1.250000e-01 : f32
      %150 = arith.mulf %149, %cst_46 : f32
      %151 = vector.broadcast %134 : vector<1x16xf32> to vector<8x16xf32>
      %152 = arith.cmpf oge, %132, %151 : vector<8x16xf32>
      %cst_47 = arith.constant 8.000000e+00 : f32
      %153 = vector.broadcast %cst_47 : f32 to vector<8x16xf32>
      %154 = arith.select %152, %6, %153 : vector<8x16xi1>, vector<8x16xf32>
      %cst_48 = arith.constant dense<0x7F800000> : vector<16xf32>
      %155 = vector.multi_reduction <minimumf>, %154, %cst_48 [0] : vector<8x16xf32> to vector<16xf32>
      %156 = vector.shape_cast %155 : vector<16xf32> to vector<1x16xf32>
      %157 = arith.cmpf oeq, %156, %33 : vector<1x16xf32>
      %158 = arith.extui %157 : vector<1x16xi1> to vector<1x16xi32>
      %159 = arith.sitofp %158 : vector<1x16xi32> to vector<1x16xf32>
      %160 = arith.mulf %11, %159 : vector<1x16xf32>
      %161 = vector.shape_cast %160 : vector<1x16xf32> to vector<1x1x16xf32>
      %cst_49 = arith.constant dense<0.000000e+00> : vector<1xf32>
      %162 = vector.multi_reduction <add>, %161, %cst_49 [1, 2] : vector<1x1x16xf32> to vector<1xf32>
      %163 = vector.shape_cast %162 : vector<1xf32> to vector<1x1x1xf32>
      %164 = vector.extract %163[0, 0, 0] : f32 from vector<1x1x1xf32>
      %cst_50 = arith.constant 1.250000e-01 : f32
      %165 = arith.mulf %164, %cst_50 : f32
      %166 = vector.broadcast %139 : vector<1x16xf32> to vector<8x16xf32>
      %167 = arith.divf %137, %166 : vector<8x16xf32>
      %168 = arith.subf %167, %37 : vector<8x16xf32>
      %169 = vector.extract_strided_slice %168 {offsets = [0, 0], sizes = [8, 8], strides = [1, 1]} : vector<8x16xf32> to vector<8x8xf32>
      %cst_51 = arith.constant 1.250000e-01 : f32
      %170 = vector.broadcast %cst_51 : f32 to vector<8x8xf32>
      %171 = arith.mulf %169, %170 : vector<8x8xf32>
      %172 = arith.truncf %171 : vector<8x8xf32> to vector<8x8xbf16>
      %173 = vector.extract_strided_slice %29 {offsets = [0, 0], sizes = [8, 32], strides = [1, 1]} : vector<16x32xbf16> to vector<8x32xbf16>
      %cst_52 = arith.constant dense<0.000000e+00> : vector<8x32xf32>
      %174 = tpu.matmul %172, %173, %cst_52 {dimension_numbers = #tpu.dot_dimension_numbers<[1], [0], [0], [1], [0, 0, 1, 1], [], []>} : vector<8x8xbf16>, vector<8x32xbf16>, vector<8x32xf32> -> vector<8x32xf32>
      %cst_53 = arith.constant 5.000000e-02 : f32
      %175 = vector.broadcast %cst_53 : f32 to vector<8x32xf32>
      %176 = arith.mulf %175, %174 : vector<8x32xf32>
      %177 = arith.subf %130, %176 : vector<8x32xf32>
      %178 = arith.truncf %177 : vector<8x32xf32> to vector<8x32xbf16>
      %cst_54 = arith.constant dense<0.000000e+00> : vector<8x16xf32>
      %179 = tpu.matmul %178, %29, %cst_54 {dimension_numbers = #tpu.dot_dimension_numbers<[1], [1], [0], [0], [0, 0, 1, 0], [], []>} : vector<8x32xbf16>, vector<16x32xbf16>, vector<8x16xf32> -> vector<8x16xf32>
      %cst_55 = arith.constant dense<0xFF800000> : vector<16xf32>
      %180 = vector.multi_reduction <maximumf>, %179, %cst_55 [0] : vector<8x16xf32> to vector<16xf32>
      %181 = vector.shape_cast %180 : vector<16xf32> to vector<1x16xf32>
      %182 = vector.broadcast %181 : vector<1x16xf32> to vector<8x16xf32>
      %183 = arith.subf %179, %182 : vector<8x16xf32>
      %184 = math.exp %183 : vector<8x16xf32>
      %cst_56 = arith.constant dense<0.000000e+00> : vector<16xf32>
      %185 = vector.multi_reduction <add>, %184, %cst_56 [0] : vector<8x16xf32> to vector<16xf32>
      %186 = vector.shape_cast %185 : vector<16xf32> to vector<1x16xf32>
      %187 = math.log %186 : vector<1x16xf32>
      %188 = arith.mulf %37, %183 : vector<8x16xf32>
      %cst_57 = arith.constant dense<0.000000e+00> : vector<16xf32>
      %189 = vector.multi_reduction <add>, %188, %cst_57 [0] : vector<8x16xf32> to vector<16xf32>
      %190 = vector.shape_cast %189 : vector<16xf32> to vector<1x16xf32>
      %191 = arith.subf %187, %190 : vector<1x16xf32>
      %192 = arith.mulf %11, %191 : vector<1x16xf32>
      %193 = vector.shape_cast %192 : vector<1x16xf32> to vector<1x1x16xf32>
      %cst_58 = arith.constant dense<0.000000e+00> : vector<1xf32>
      %194 = vector.multi_reduction <add>, %193, %cst_58 [1, 2] : vector<1x1x16xf32> to vector<1xf32>
      %195 = vector.shape_cast %194 : vector<1xf32> to vector<1x1x1xf32>
      %196 = vector.extract %195[0, 0, 0] : f32 from vector<1x1x1xf32>
      %cst_59 = arith.constant 1.250000e-01 : f32
      %197 = arith.mulf %196, %cst_59 : f32
      %198 = vector.broadcast %181 : vector<1x16xf32> to vector<8x16xf32>
      %199 = arith.cmpf oge, %179, %198 : vector<8x16xf32>
      %cst_60 = arith.constant 8.000000e+00 : f32
      %200 = vector.broadcast %cst_60 : f32 to vector<8x16xf32>
      %201 = arith.select %199, %6, %200 : vector<8x16xi1>, vector<8x16xf32>
      %cst_61 = arith.constant dense<0x7F800000> : vector<16xf32>
      %202 = vector.multi_reduction <minimumf>, %201, %cst_61 [0] : vector<8x16xf32> to vector<16xf32>
      %203 = vector.shape_cast %202 : vector<16xf32> to vector<1x16xf32>
      %204 = arith.cmpf oeq, %203, %33 : vector<1x16xf32>
      %205 = arith.extui %204 : vector<1x16xi1> to vector<1x16xi32>
      %206 = arith.sitofp %205 : vector<1x16xi32> to vector<1x16xf32>
      %207 = arith.mulf %11, %206 : vector<1x16xf32>
      %208 = vector.shape_cast %207 : vector<1x16xf32> to vector<1x1x16xf32>
      %cst_62 = arith.constant dense<0.000000e+00> : vector<1xf32>
      %209 = vector.multi_reduction <add>, %208, %cst_62 [1, 2] : vector<1x1x16xf32> to vector<1xf32>
      %210 = vector.shape_cast %209 : vector<1xf32> to vector<1x1x1xf32>
      %211 = vector.extract %210[0, 0, 0] : f32 from vector<1x1x1xf32>
      %cst_63 = arith.constant 1.250000e-01 : f32
      %212 = arith.mulf %211, %cst_63 : f32
      %cst_64 = arith.constant 0.000000e+00 : f32
      %213 = vector.broadcast %cst_64 : f32 to vector<8x128xf32>
      %cst_65 = arith.constant 0.000000e+00 : f32
      %214 = vector.broadcast %cst_65 : f32 to vector<8x128xf32>
      %c0_i32_66 = arith.constant 0 : i32
      %215 = vector.broadcast %c0_i32_66 : i32 to vector<8x128xi32>
      %216 = arith.cmpi eq, %12, %215 : vector<8x128xi32>
      %217 = vector.broadcast %56 : f32 to vector<8x128xf32>
      %218 = arith.select %216, %217, %213 : vector<8x128xi1>, vector<8x128xf32>
      %219 = vector.broadcast %71 : f32 to vector<8x128xf32>
      %220 = arith.select %216, %219, %214 : vector<8x128xi1>, vector<8x128xf32>
      %c1_i32_67 = arith.constant 1 : i32
      %221 = vector.broadcast %c1_i32_67 : i32 to vector<8x128xi32>
      %222 = arith.cmpi eq, %12, %221 : vector<8x128xi32>
      %223 = vector.broadcast %103 : f32 to vector<8x128xf32>
      %224 = arith.select %222, %223, %218 : vector<8x128xi1>, vector<8x128xf32>
      %225 = vector.broadcast %118 : f32 to vector<8x128xf32>
      %226 = arith.select %222, %225, %220 : vector<8x128xi1>, vector<8x128xf32>
      %c2_i32_68 = arith.constant 2 : i32
      %227 = vector.broadcast %c2_i32_68 : i32 to vector<8x128xi32>
      %228 = arith.cmpi eq, %12, %227 : vector<8x128xi32>
      %229 = vector.broadcast %150 : f32 to vector<8x128xf32>
      %230 = arith.select %228, %229, %224 : vector<8x128xi1>, vector<8x128xf32>
      %231 = vector.broadcast %165 : f32 to vector<8x128xf32>
      %232 = arith.select %228, %231, %226 : vector<8x128xi1>, vector<8x128xf32>
      %c3_i32 = arith.constant 3 : i32
      %233 = vector.broadcast %c3_i32 : i32 to vector<8x128xi32>
      %234 = arith.cmpi eq, %12, %233 : vector<8x128xi32>
      %235 = vector.broadcast %197 : f32 to vector<8x128xf32>
      %236 = arith.select %234, %235, %230 : vector<8x128xi1>, vector<8x128xf32>
      %237 = vector.broadcast %212 : f32 to vector<8x128xf32>
      %238 = arith.select %234, %237, %232 : vector<8x128xi1>, vector<8x128xf32>
      %c0_69 = arith.constant 0 : index
      %c0_70 = arith.constant 0 : index
      %c0_71 = arith.constant 0 : index
      %239 = vector.load %arg5[%c0_69, %c0_70, %c0_71] : memref<1x8x128xf32, #tpu.memory_space<vmem>>, vector<1x8x128xf32>
      %240 = vector.shape_cast %239 : vector<1x8x128xf32> to vector<8x128xf32>
      %241 = arith.addf %240, %236 : vector<8x128xf32>
      %c0_72 = arith.constant 0 : index
      %c0_73 = arith.constant 0 : index
      %c0_74 = arith.constant 0 : index
      %242 = vector.load %arg5[%c0_72, %c0_73, %c0_74] : memref<1x8x128xf32, #tpu.memory_space<vmem>>, vector<1x8x128xf32>
      %243 = vector.shape_cast %242 : vector<1x8x128xf32> to vector<8x128xf32>
      %244 = vector.shape_cast %241 : vector<8x128xf32> to vector<1x8x128xf32>
      tpu.vector_store %arg5[%c0_72, %c0_73, %c0_74], %244 {strides = array<i32>} : memref<1x8x128xf32, #tpu.memory_space<vmem>>, vector<1x8x128xf32>,
      %c0_75 = arith.constant 0 : index
      %c0_76 = arith.constant 0 : index
      %c0_77 = arith.constant 0 : index
      %245 = vector.load %arg6[%c0_75, %c0_76, %c0_77] : memref<1x8x128xf32, #tpu.memory_space<vmem>>, vector<1x8x128xf32>
      %246 = vector.shape_cast %245 : vector<1x8x128xf32> to vector<8x128xf32>
      %247 = arith.addf %246, %238 : vector<8x128xf32>
      %c0_78 = arith.constant 0 : index
      %c0_79 = arith.constant 0 : index
      %c0_80 = arith.constant 0 : index
      %248 = vector.load %arg6[%c0_78, %c0_79, %c0_80] : memref<1x8x128xf32, #tpu.memory_space<vmem>>, vector<1x8x128xf32>
      %249 = vector.shape_cast %248 : vector<1x8x128xf32> to vector<8x128xf32>
      %250 = vector.shape_cast %247 : vector<8x128xf32> to vector<1x8x128xf32>
      tpu.vector_store %arg6[%c0_78, %c0_79, %c0_80], %250 {strides = array<i32>} : memref<1x8x128xf32, #tpu.memory_space<vmem>>, vector<1x8x128xf32>,
    }
    return
  }
  func.func @transform_0(%arg0: i32, %arg1: i32) -> (i32, i32, i32) {
    %c2_i32 = arith.constant 2 : i32
    %0 = arith.muli %arg0, %c2_i32 : i32
    %1 = arith.addi %0, %arg1 : i32
    %c0_i32 = arith.constant 0 : i32
    %c0_i32_0 = arith.constant 0 : i32
    %c0_i32_1 = arith.constant 0 : i32
    return %1, %c0_i32, %c0_i32_0 : i32, i32, i32
  }
  func.func @transform_1(%arg0: i32, %arg1: i32) -> (i32, i32, i32) {
    %c2_i32 = arith.constant 2 : i32
    %0 = arith.muli %arg0, %c2_i32 : i32
    %1 = arith.addi %0, %arg1 : i32
    %c0_i32 = arith.constant 0 : i32
    %c0_i32_0 = arith.constant 0 : i32
    %c0_i32_1 = arith.constant 0 : i32
    return %1, %c0_i32, %c0_i32_0 : i32, i32, i32
  }
  func.func @transform_2(%arg0: i32, %arg1: i32) -> (i32, i32) {
    %c0_i32 = arith.constant 0 : i32
    %c0_i32_0 = arith.constant 0 : i32
    %c0_i32_1 = arith.constant 0 : i32
    return %c0_i32, %c0_i32_0 : i32, i32
  }
  func.func @transform_3(%arg0: i32, %arg1: i32) -> (i32, i32, i32) {
    %c0_i32 = arith.constant 0 : i32
    %c0_i32_0 = arith.constant 0 : i32
    %c0_i32_1 = arith.constant 0 : i32
    return %arg0, %c0_i32, %c0_i32_0 : i32, i32, i32
  }
  func.func @transform_4(%arg0: i32, %arg1: i32) -> (i32, i32, i32) {
    %c0_i32 = arith.constant 0 : i32
    %c0_i32_0 = arith.constant 0 : i32
    %c0_i32_1 = arith.constant 0 : i32
    return %arg0, %c0_i32, %c0_i32_0 : i32, i32, i32
  }
}

</mosaic_0001>

<bundles_post_ra>
// kernel: tpu_custom_call.1
= control target key start
LH: loop header
LB: loop body
LE: loop exit
PB: predicated region body
PF: predicated region fallthrough
CT: control target
= control target key end

     0   :  { %s1910_s0 = inlined_call_operand.hbm [shape: bf16[4,16,32], index: 0, kind: input, shape index: {}]   ;;  %s1911_s1 = inlined_call_operand.hbm [shape: s32[4,1,16], index: 1, kind: input, shape index: {}]   ;;  %s1912_s2 = inlined_call_operand.hbm [shape: f32[8,32], index: 2, kind: input, shape index: {}]   ;;  %s1913_s3 = inlined_call_operand.hbm [shape: f32[1,8,128], index: 3, kind: output, shape index: {0}]   ;;  %s1914_s4 = inlined_call_operand.hbm [shape: f32[1,8,128], index: 4, kind: output, shape index: {1}]  }
   0x1   :  { %1918 = sst [smem:[#allocation17_spill]] %s1910_s0 }
   0x2   :  { %1919 = sst [smem:[#allocation18_spill]] %s1912_s2 }
   0x3   :  { %10 = vsyncpa [#allocation3], 0 }
   0x4   :  { %12 = vsyncpa [#allocation3 + $0x1], 0 }
   0x5   :  { %13 = vsyncpa [#allocation6], 0 }
   0x6   :  { %15 = vsyncpa [#allocation6 + $0x1], 0 }
   0x7   :  { %16 = vsyncpa [#allocation4], 0 }
   0x8   :  { %17 = vsyncpa [#allocation10], 0  ;;  %s1596_s15 = smov 0   ;;  %s1598_s16 = smov 0  }
   0x9   :  { %s1600_s17 = smov 0   ;;  %s1602_s18 = smov 0  }
   0xa   :  { %s1604_s19 = smov 0   ;;  %s1606_s20 = smov 0  }
   0xb LB: > { %s1625_s21 = sadd.s32 4294967295, %s1552_s20   ;;  %s46_s22 = sadd.s32 1, %s1540_s17  ;;  %s1552_s20 = sphi %s1606_s20, %s23_s20   ;;  %s1548_s19 = sphi %s1604_s19, %s1934_s19   ;;  %s1544_s18 = sphi %s1602_s18, %s1933_s18   ;;  %s1540_s17 = sphi %s1600_s17, %s1932_s17   ;;  %s1536_s16 = sphi %s1598_s16, %s1931_s16   ;;  %s1532_s15 = sphi %s1596_s15, %s1930_s15  }
   0xc   : > { %p53_p0 = scmp.ne.s32.totalorder %s1540_s17, %s1536_s16  ;;  %p54_p1 = scmp.eq.s32.totalorder %s1552_s20, 0 }
   0xd   : > { %p59_p2 = scmp.ne.s32.totalorder %s1536_s16, %s1532_s15  ;;  %p60_p3 = scmp.eq.s32.totalorder %s1625_s21, 0 }
   0xe   : > { %p55_p4 = por %p54_p1, %p53_p0  ;;  %p1106_p5 = scmp.ge.s32.totalorder %s1552_s20, 1 }
   0xf   : > { %p1636_p6 = por %p60_p3, %p59_p2  ;;  %p173_p7 = scmp.lt.s32.totalorder %s1552_s20, 3 }
  0x10   : > { %s1558_s25 = smov [#allocation7]   ;;  %p1256_p10 = scmp.lt.s32.totalorder %s1552_s20, 2 }
  0x11   : > { %s1920_s23 = scalar_select %p1636_p6, 1, 0 }
  0x12   : > { %p1641_p8 = pnand %p1106_p5, %p173_p7  ;;  %s186_s26 = sshll.u32 %s1558_s25, 4  ;;  %s187_s26 = int_to_ptr.vmem [resolvable:$true] %s186_s26 }
  0x13   : > { %s1649_s27 = sand.u32 1, %s1540_s17   ;;  %p1653_p12 = pnand %p1256_p10, %p55_p4 }
  0x14   : > { %s1921_s24 = scalar_select %p1641_p8, 1, 0 }
  0x15   : > { %p1244_p9 = pneg %p1641_p8  ;;  %s1363_s29 = scalar_lea.vmem %s187_s26, 128 }
  0x16   : > { %p1364_p0 = scmp.ne.s32.totalorder %s187_s26, %s1363_s29  ;;  %p1371_p5 = scmp.lt.s32.totalorder %s187_s26, %s187_s26 }
  0x17   : > { %p1245_p11 = pnand %p1244_p9, %p60_p3  ;;  %p1372_p7 = scmp.lt.s32.totalorder %s1363_s29, %s1363_s29 }
  0x19   : > { %p1354_p13 = pneg %p1245_p11  ;;  %p1373_p6 = por %p1372_p7, %p1371_p5 }
  0x1b   : > { %p1366_p1 = pnand %p1364_p0, %p1354_p13 }
  0x1d   : > { %p1367_p2 = pneg %p1366_p1 }
  0x1f   : > { %p1374_p8 = pnand %p1373_p6, %p1367_p2 }
  0x21   : > { %1377 = shalt.err (!%p1374_p8)
}
  0x22   : > { %s1923_s2 = sld [smem:[#allocation18_spill]]  ;;  %s32_s6 = sadd.s32 1, %s1548_s19 }
  0x23   : > { %s1109_s7 = sshll.u32 %s1649_s27, 4  ;;  %p33_p4 = scmp.ge.s32.totalorder %s32_s6, 2 }
  0x24   : > { %s1151_s8 = sshll.u32 %s1548_s19, 8  ;;  %s201_s9 = scalar_lea.vmem [#allocation2], %s1109_s7 }
  0x25   : > { %s211_s10 = sshll.u32 %s201_s9, 4  ;;  %s1936_s6 = smov (%p33_p4, %s32_s6), 0  ;;  %s212_s10 = int_to_ptr.vmem [resolvable:$true] %s211_s10 }
  0x26   : > { %1924 = sst [smem:[#allocation16_spill]] %s1936_s6  ;;  %s43_s14 = ssub.s32 %s1548_s19, %s1936_s6 }
  0x27   : > { %s1925_s0 = sld [smem:[#allocation17_spill]]  ;;  %p1670_p6 = scmp.eq.s32.totalorder %s43_s14, 0 }
  0x28   : > { %1247 = dma.hbm_to_vmem [thread:$0]  (!%p1245_p11), %s1923_s2, 128, %s187_s26, [#allocation6]  }
  0x29   : > { %s198_s25 = scalar_lea.sflag [#allocation3], %s1649_s27  ;;  %p1380_p8 = pneg %p1653_p12 }
  0x2a   : > { %s1391_s26 = scalar_lea.vmem %s212_s10, 256  ;;  %s1559_s29 = smov [#allocation2]  }
  0x2b   : > { %p1392_p9 = scmp.ne.s32.totalorder %s212_s10, %s1391_s26  ;;  %s1396_s30 = sshll.u32 %s1559_s29, 4  ;;  %s1397_s30 = int_to_ptr.vmem [resolvable:$false] %s1396_s30 }
  0x2c   : > { %s1398_s5 = scalar_lea.vmem %s1397_s30, 512  ;;  %p1399_p13 = scmp.lt.s32.totalorder %s212_s10, %s1397_s30 }
  0x2d   : > { %s210_s13 = scalar_lea.hbm %s1925_s0, %s1151_s8  ;;  %p1394_p10 = pnand %p1392_p9, %p1380_p8 }
  0x2e   : > { %p1400_p0 = scmp.lt.s32.totalorder %s1398_s5, %s1391_s26 }
  0x2f   : > { %p1395_p11 = pneg %p1394_p10 }
  0x30   : > { %p1401_p1 = por %p1400_p0, %p1399_p13 }
  0x32   : > { %p1402_p2 = pnand %p1401_p1, %p1395_p11 }
  0x34   : > { %1405 = shalt.err (!%p1402_p2)
}
  0x35   : > { %s1560_s7 = smov 64   ;;  %s1561_s8 = smov 4  }
  0x36   : > { %1251 = dma.hbm_to_vmem [thread:$0]  (!%p1653_p12), %s210_s13, 256, %s212_s10, %s198_s25, %s1560_s7, %s1560_s7, %s1561_s8  }
  0x37   : > { %s1687_s9 = scalar_select %p1670_p6, %s1540_s17, %s46_s22  }
  0x38   : > { %s221_s11 = sand.u32 1, %s1552_s20   ;;  %s1113_s12 = sshll.u32 %s1649_s27, 1 }
  0x39   : > { %s1152_s14 = sshll.u32 %s1548_s19, 5  ;;  %s225_s26 = scalar_lea.vmem [#allocation5], %s1113_s12 }
  0x3a   : > { %s234_s29 = sshll.u32 %s225_s26, 4  ;;  %s233_s0 = scalar_lea.hbm %s1911_s1, %s1152_s14  ;;  %s235_s29 = int_to_ptr.vmem [resolvable:$true] %s234_s29 }
  0x3b   : > { %s222_s2 = scalar_lea.sflag [#allocation6], %s221_s11  ;;  %s1419_s6 = scalar_lea.vmem %s235_s29, 32 }
  0x3c   : > { %p1420_p5 = scmp.ne.s32.totalorder %s235_s29, %s1419_s6  ;;  %s1562_s10 = smov [#allocation5]  }
  0x3d   : > { %s1424_s22 = sshll.u32 %s1562_s10, 4  ;;  %s1425_s22 = int_to_ptr.vmem [resolvable:$false] %s1424_s22 }
  0x3e   : > { %p1422_p7 = pnand %p1420_p5, %p1380_p8  ;;  %s1426_s13 = scalar_lea.vmem %s1425_s22, 64 }
  0x3f   : > { %p1427_p6 = scmp.lt.s32.totalorder %s235_s29, %s1425_s22  ;;  %p1428_p9 = scmp.lt.s32.totalorder %s1426_s13, %s1419_s6 }
  0x40   : > { %p1423_p4 = pneg %p1422_p7 }
  0x41   : > { %p1429_p10 = por %p1428_p9, %p1427_p6 }
  0x43   : > { %p1430_p11 = pnand %p1429_p10, %p1423_p4 }
  0x45   : > { %1433 = shalt.err (!%p1430_p11)
}
  0x46   : > { %s1563_s27 = smov 16   ;;  %s1564_s15 = smov 1  }
  0x47   : > { %1254 = dma.hbm_to_vmem [thread:$0]  (!%p1653_p12), %s233_s0, 32, %s235_s29, %s222_s2, %s1563_s27, %s1563_s27, %s1564_s15  }
  0x48   : > { %p1927_p13 = scmp.ne.s32.totalorder %s1921_s24, 0 }
  0x49   : > { %s248_s25 = sand.u32 (!%p1927_p13), 1, %s1536_s16   ;;  %p1928_p8 = scmp.ne.s32.totalorder (!%p1927_p13), %s1920_s23, 0 }
  0x4a   : > { %246 = sbr.rel (%p1927_p13) target bundleno = 1991 (0x7c7), region = 32  ;;  %s1117_s7 = sshll.u32 (!%p1927_p13), %s248_s25, 4 }
  0x4b   : > { %s249_s8 = scalar_lea.sflag (!%p1927_p13), [#allocation3], %s248_s25  ;;  %s1703_s11 = scalar_lea.vmem (!%p1927_p13), [#allocation2], %s1117_s7 }
  0x4f   : > { %1511 = dma.done.wait (%p1928_p8), %s249_s8, 256  }
  0x50   : > { %1513 = vsyncadd (%p1928_p8), %s249_s8, 4294967040  ;;  %s257_s6 = sand.u32 1, %s1625_s21   ;;  %s1118_s28 = sshll.u32 %s248_s25, 1 }
  0x51   : > { %s258_s0 = scalar_lea.sflag [#allocation6], %s257_s6  ;;  %s1710_s2 = scalar_lea.vmem [#allocation5], %s1118_s28 }
  0x52   : > { %1515 = dma.done.wait (%p1928_p8), %s258_s0, 32  }
  0x53   : > { %1517 = vsyncadd (%p1928_p8), %s258_s0, 4294967264 }
  0x54   : > { %1519 = dma.done.wait (%p60_p3), [#allocation6], 128  }
  0x55   : > { %1521 = vsyncadd (%p60_p3), [#allocation6], 4294967168  ;;  %p1120_p12 = scmp.ne.s32.totalorder %s1544_s18, 0 }
  0x57   : > { %300 = sbr.rel (%p1120_p12) target bundleno = 94 (0x5e), region = 48 }
  0x5c   : > { %v1565_v0 = vmov 0.0  }
  0x5d   : > { %301 = vst [vmem:[#allocation8] sm:$0xff] %v1565_v0  ;;  %302 = vst [vmem:[#allocation9] sm:$0xff] %v1565_v0 }
  0x5e PF: > { %v1721_v1 = vld [vmem:[#allocation7] sm:$0xff]  ;;  %v305_v2 = vlaneseq  ;;  %s1122_s24 = sshll.u32 %s1544_s18, 1  ;;  %v1566_v7 = vmov 0.0  }
  0x5f   : > { %v304_v3 = vpack.c.bf16 %v1721_v1, %v1721_v1  ;;  %s316_s23 = ssub.s32 4, %s1122_s24 }
  0x60   : > { %v1726_v4 = vshrl.u32 %v305_v2, 7  ;;  %v309_v5 = vand.u32 127, %v305_v2  ;;  %p317_p3 = scmp.lt.s32.totalorder %s316_s23, 2  ;;  %p1123_p0 = scmp.gt.s32.totalorder %s316_s23, 0 }
  0x62   : > { %v1729_v6 = vcvt.s32.f32 %v1726_v4  ;;  %vm310_vm0 = vcmp.ge.s32.totalorder %v309_v5, 8  ;;  %s1938_s23 = smov (!%p317_p3, %s316_s23), 2 }
  0x63   : > { %v1731_v8 = vsel %vm310_vm0, 1.0, %v1566_v7  ;;  %s1940_s23 = smov (!%p1123_p0, %s1938_s23), 0 }
  0x64   : > { %p1128_p1 = scmp.le.s32.totalorder %s1940_s23, 0 }
  0x65   : > { %s1736_s18 = smov (!%p1128_p1), 0  }
  0x66   : > { %1049 = sbr.rel (%p1128_p1) target bundleno = 1963 (0x7ab), region = 103 }
  0x6b LB: >> { %v1567_v9 = vmov 0.0   ;;  %vm1568_vm1 = vmmov 0   ;;  %s1155_s12 = sshll.u32 %s1556_s18, 3  ;;  %vm347_vm2 = vcmask 261120   ;;  %vm469_vm3 = vcmask 1043456   ;;  %s332_s26 = scalar_lea.vmem %s1710_s2, %s1556_s18 [#allocation5]  ;;  %s1556_s18 = sphi %s1736_s18, %s324_s18  }
  0x6c   : >> { %1170 = vmatprep.subr.bf16.mxu0 %v1567_v9  ;;  %1172 = vmatprep.mubr.msk.bf16.mxu0 %vm1568_vm1, %v1567_v9  ;;  %s329_s14 = scalar_lea.vmem %s1703_s11, %s1155_s12 [#allocation2]  ;;  %vm394_vm4 = vcmask 130048   ;;  %v337_v31 = vsub.s32 0, %v1726_v4  ;;  %v333_v32 = vld [vmem:[%s332_s26] sm:$0x1]  ;;  %vm424_vm8 = vcmask 122880   ;;  %vm465_vm9 = vcmask 64512  }
  0x6d   : >> { %1176 = vmatprep.subr.bf16.mxu1 %v1567_v9  ;;  %1178 = vmatprep.mubr.msk.bf16.mxu1 %vm1568_vm1, %v1567_v9  ;;  %v330_v10 = vld [vmem:[%s329_s14] sm:$0xf]  ;;  %v331_v11 = vld [vmem:[%s329_s14 + $0x4] sm:$0xf]  ;;  %v1772_v37 = vcvt.s32.f32 %v333_v32  ;;  %vm939_vm0 = vcmp.eq.s32.totalorder %v1726_v4, 0  ;;  %s324_s18 = sadd.s32 1, %s1556_s18  }
  0x6e   : >> { %v1132_v12 = vcombine.low %v330_v10, %v331_v11  ;;  %v1760_v14 = vsel %vm469_vm3, %v330_v10, 0  ;;  %v338_v35 = vrot.slane %v333_v32, %v337_v31  ;;  %vm954_vm3 = vcmp.eq.s32.totalorder %v1726_v4, 3  ;;  %p323_p2 = scmp.ge.s32.totalorder %s324_s18, %s1940_s23 }
  0x6f   : >> { %1177 = vmatpush3.bf16.msra.mxu1 %v1760_v14 }
  0x70   : >> { %v1750_v13 = vsel %vm347_vm2, %v1132_v12, 0  ;;  %1182 = vmatprep.subr.bf16.mxu1 %v1567_v9  ;;  %vm339_vm6 = vcmp.eq.s32.totalorder %v1726_v4, %v338_v35 }
  0x71   : >> { %1171 = vmatpush3.bf16.xpose.msra.mxu0 %v1750_v13  ;;  %v1776_v40 = vsel %vm339_vm6, 1.0, %v1567_v9 }
  0x72   : >> { %1188 = vmatprep.subr.bf16.mxu0 %v1567_v9 }
  0x78   : >> { %1173 = vmatmul.mubr.msk.bf16.vlgmr.msra.gmra.mxu0 %vm347_vm2, %v304_v3 }
  0x79   : >> { %1190 = vmatprep.mubr.msk.bf16.mxu0 %vm1568_vm1, %v1567_v9  ;;  %1189 = vmatpush3.bf16.msra.mxu0 %v1760_v14 }
  0x7a   : >> { %1200 = vmatprep.subr.bf16.mxu0 %v1567_v9 }
 0x138   : >> { %v388_v15 = vpop.f32.mrf.mxu0 }
 0x139   : >> { %v395_v16 = vsel %vm394_vm4, %v388_v15, -inf }
 0x13a   : >> { %v396_v17 = vrot.slane %v395_v16, 4  ;;  %v1174_v18 = vpop.f32.mrf.mxu0 }
 0x13c   : >> { %v397_v19 = vmax.f32 %v395_v16, %v396_v17  ;;  %v391_v20 = vpop.f32.mrf.mxu0 }
 0x13e   : >> { %v398_v21 = vrot.slane %v397_v19, 2  ;;  %v1175_v22 = vpop.f32.mrf.mxu0 }
 0x140   : >> { %v399_v23 = vmax.f32 %v397_v19, %v398_v21 }
 0x142   : >> { %v400_v24 = vrot.slane %v399_v23, 1 }
 0x144   : >> { %v401_v25 = vmax.f32 %v399_v23, %v400_v24 }
 0x146   : >> { %v402_v26 = vsub.f32 %v388_v15, %v401_v25  ;;  %vm436_vm5 = vcmp.ge.f32.partialorder %v388_v15, %v401_v25 }
 0x147   : >> { %v437_v27 = vsel %vm436_vm5, %v1729_v6, 8.0 }
 0x148   : >> { %v403_v28 = vmul.f32 1.442695, %v402_v26  ;;  %v438_v29 = vsel %vm394_vm4, %v437_v27, inf  ;;  %v414_v44 = vmul.f32 %v1776_v40, %v402_v26 }
 0x149   : >> { %v439_v30 = vrot.slane %v438_v29, 4 }
 0x14a   : >> { %1330 = vpow2.f32 %v403_v28  ;;  %v415_v49 = vsel %vm394_vm4, %v414_v44, 0.0 }
 0x14b   : >> { %v440_v33 = vmin.f32 %v438_v29, %v439_v30  ;;  %v416_v51 = vrot.slane %v415_v49, 4 }
 0x14d   : >> { %v441_v34 = vrot.slane %v440_v33, 2  ;;  %v417_v54 = vadd.f32 %v416_v51, %v415_v49 }
 0x14f   : >> { %v442_v36 = vmin.f32 %v440_v33, %v441_v34  ;;  %v418_v56 = vrot.slane %v417_v54, 2 }
 0x151   : >> { %v443_v38 = vrot.slane %v442_v36, 1  ;;  %v419_v57 = vadd.f32 %v418_v56, %v417_v54 }
 0x153   : >> { %v444_v39 = vmin.f32 %v442_v36, %v443_v38  ;;  %v420_v58 = vrot.slane %v419_v57, 1 }
 0x155   : >> { %vm445_vm7 = vcmp.eq.f32.partialorder %v444_v39, %v1772_v37  ;;  %v421_v62 = vadd.f32 %v420_v58, %v419_v57 }
 0x156   : >> { %v1134_v41 = vsel %vm445_vm7, 1.0, %v1567_v9 }
 0x157   : >> { %v1331_v42 = vpop.eup %1330  ;;  %v448_v43 = vmul.f32 %v1134_v41, %v1731_v8 }
 0x158   : >> { %v405_v45 = vsel %vm394_vm4, %v1331_v42, 0.0 }
 0x159   : >> { %v449_v46 = vsel %vm424_vm8, %v448_v43, 0.0  ;;  %v406_v47 = vrot.slane %v405_v45, 4 }
 0x15a   : >> { %450 = vadd.xlane.f32.xlu0 %v449_v46 }
 0x15b   : >> { %v407_v48 = vadd.f32 %v406_v47, %v405_v45 }
 0x15d   : >> { %v408_v50 = vrot.slane %v407_v48, 2 }
 0x15f   : >> { %v409_v52 = vadd.f32 %v408_v50, %v407_v48 }
 0x161   : >> { %v410_v53 = vrot.slane %v409_v52, 1 }
 0x163   : >> { %v411_v55 = vadd.f32 %v410_v53, %v409_v52 }
 0x165   : >> { %1332 = vlog2.f32 %v411_v55 }
 0x166   : >> { %1334 = vrcp.f32 %v411_v55 }
 0x172   : >> { %v1333_v59 = vpop.eup %1332 }
 0x173   : >> { %v1335_v60 = vpop.eup %1334  ;;  %v413_v61 = vmul.f32 0.6931472, %v1333_v59 }
 0x174   : >> { %v461_v63 = vmul.f32 %v1335_v60, %v1331_v42 }
 0x175   : >> { %v422_v0 = vsub.f32 %v413_v61, %v421_v62 }
 0x176   : >> { %v462_v2 = vsub.f32 %v461_v63, %v1776_v40 }
 0x177   : >> { %v423_v5 = vmul.f32 %v1731_v8, %v422_v0 }
 0x178   : >> { %v463_v7 = vmul.f32 0.125, %v462_v2 }
 0x179   : >> { %v425_v10 = vsel %vm424_vm8, %v423_v5, 0.0 }
 0x17a   : >> { %426 = vadd.xlane.f32.xlu0 %v425_v10  ;;  %v464_v11 = vpack.c.bf16 %v463_v7, %v463_v7 }
 0x17c   : >> { %1179 = vmatmul.mubr.msk.bf16.vlgmr.msra.gmra.mxu1 %vm465_vm9, %v464_v11 }
 0x17d   : >> { %1183 = vmatpush3.bf16.xpose.msra.mxu1 %v1750_v13  ;;  %1184 = vmatprep.mubr.msk.bf16.mxu1 %vm1568_vm1, %v1567_v9 }
 0x17e   : >> { %1194 = vmatprep.subr.bf16.mxu1 %v1567_v9 }
 0x1e3   : >> { %v451_v12 = vpop.xlane.xlu0 %450 }
 0x1e4   : >> { %v452_v15 = vrot.slane %v451_v12, 4 }
 0x1e6   : >> { %v453_v16 = vadd.f32 %v452_v15, %v451_v12 }
 0x1e8   : >> { %v454_v17 = vrot.slane %v453_v16, 2 }
 0x1ea   : >> { %v455_v21 = vadd.f32 %v454_v17, %v453_v16 }
 0x1ec   : >> { %v456_v24 = vrot.slane %v455_v21, 1 }
 0x1ee   : >> { %v457_v27 = vadd.f32 %v456_v24, %v455_v21 }
 0x203   : >> { %v427_v18 = vpop.xlane.xlu0 %426 }
 0x204   : >> { %v428_v19 = vrot.slane %v427_v18, 4 }
 0x206   : >> { %v429_v20 = vadd.f32 %v428_v19, %v427_v18 }
 0x208   : >> { %v430_v22 = vrot.slane %v429_v20, 2 }
 0x20a   : >> { %v431_v23 = vadd.f32 %v430_v22, %v429_v20 }
 0x20c   : >> { %v432_v25 = vrot.slane %v431_v23, 1 }
 0x20e   : >> { %v433_v26 = vadd.f32 %v432_v25, %v431_v23 }
 0x210   : >> { %1212 = vpush %v433_v26 }
 0x211   : >> { %1214 = vpush %v457_v27 }
 0x23c   : >> { %v507_v28 = vpop.f32.mrf.mxu1 }
 0x23d   : >> { %v513_v29 = vmul.f32 0.05, %v507_v28 }
 0x23e   : >> { %v1180_v30 = vpop.f32.mrf.mxu1 }
 0x23f   : >> { %v1794_v31 = vsub.f32 %v1721_v1, %v513_v29 }
 0x240   : >> { %v510_v32 = vpop.f32.mrf.mxu1 }
 0x241   : >> { %v515_v33 = vpack.c.bf16 %v1794_v31, %v1794_v31  ;;  %s1213_s29 = spop %1212 }
 0x242   : >> { %v1181_v34 = vpop.f32.mrf.mxu1  ;;  %s1215_s30 = spop %1214  ;;  %s435_s22 = smul.f32 0.125, %s1213_s29 }
 0x243   : >> { %1185 = vmatmul.mubr.msk.bf16.vlgmr.msra.gmra.mxu1 %vm347_vm2, %v515_v33  ;;  %s459_s27 = smul.f32 0.125, %s1215_s30 }
 0x244   : >> { %1195 = vmatpush3.bf16.xpose.msra.mxu1 %v1750_v13  ;;  %1196 = vmatprep.mubr.msk.bf16.mxu1 %vm1568_vm1, %v1567_v9 }
 0x245   : >> { %1206 = vmatprep.subr.bf16.mxu1 %v1567_v9 }
 0x303   : >> { %v553_v35 = vpop.f32.mrf.mxu1 }
 0x304   : >> { %v559_v36 = vsel %vm394_vm4, %v553_v35, -inf }
 0x305   : >> { %v560_v38 = vrot.slane %v559_v36, 4  ;;  %v1186_v39 = vpop.f32.mrf.mxu1 }
 0x307   : >> { %v561_v41 = vmax.f32 %v559_v36, %v560_v38  ;;  %v556_v42 = vpop.f32.mrf.mxu1 }
 0x309   : >> { %v562_v43 = vrot.slane %v561_v41, 2  ;;  %v1187_v44 = vpop.f32.mrf.mxu1 }
 0x30b   : >> { %v563_v45 = vmax.f32 %v561_v41, %v562_v43 }
 0x30d   : >> { %v564_v46 = vrot.slane %v563_v45, 1 }
 0x30f   : >> { %v565_v47 = vmax.f32 %v563_v45, %v564_v46 }
 0x311   : >> { %v566_v48 = vsub.f32 %v553_v35, %v565_v47  ;;  %vm599_vm10 = vcmp.ge.f32.partialorder %v553_v35, %v565_v47 }
 0x312   : >> { %v600_v49 = vsel %vm599_vm10, %v1729_v6, 8.0 }
 0x313   : >> { %v567_v50 = vmul.f32 1.442695, %v566_v48  ;;  %v601_v51 = vsel %vm394_vm4, %v600_v49, inf  ;;  %v578_v61 = vmul.f32 %v1776_v40, %v566_v48 }
 0x314   : >> { %v602_v52 = vrot.slane %v601_v51, 4 }
 0x315   : >> { %1336 = vpow2.f32 %v567_v50  ;;  %v579_v5 = vsel %vm394_vm4, %v578_v61, 0.0 }
 0x316   : >> { %v603_v53 = vmin.f32 %v601_v51, %v602_v52  ;;  %v580_v10 = vrot.slane %v579_v5, 4 }
 0x318   : >> { %v604_v54 = vrot.slane %v603_v53, 2  ;;  %v581_v15 = vadd.f32 %v580_v10, %v579_v5 }
 0x31a   : >> { %v605_v55 = vmin.f32 %v603_v53, %v604_v54  ;;  %v582_v17 = vrot.slane %v581_v15, 2 }
 0x31c   : >> { %v606_v56 = vrot.slane %v605_v55, 1  ;;  %v583_v18 = vadd.f32 %v582_v17, %v581_v15 }
 0x31e   : >> { %v607_v57 = vmin.f32 %v605_v55, %v606_v56  ;;  %v584_v19 = vrot.slane %v583_v18, 1 }
 0x320   : >> { %vm608_vm11 = vcmp.eq.f32.partialorder %v607_v57, %v1772_v37  ;;  %v585_v23 = vadd.f32 %v584_v19, %v583_v18 }
 0x321   : >> { %v1137_v58 = vsel %vm608_vm11, 1.0, %v1567_v9 }
 0x322   : >> { %v1337_v59 = vpop.eup %1336  ;;  %v611_v60 = vmul.f32 %v1137_v58, %v1731_v8 }
 0x323   : >> { %v569_v62 = vsel %vm394_vm4, %v1337_v59, 0.0 }
 0x324   : >> { %v612_v63 = vsel %vm424_vm8, %v611_v60, 0.0  ;;  %v570_v0 = vrot.slane %v569_v62, 4 }
 0x325   : >> { %613 = vadd.xlane.f32.xlu1 %v612_v63 }
 0x326   : >> { %v571_v2 = vadd.f32 %v570_v0, %v569_v62 }
 0x328   : >> { %v572_v7 = vrot.slane %v571_v2, 2 }
 0x32a   : >> { %v573_v11 = vadd.f32 %v572_v7, %v571_v2 }
 0x32c   : >> { %v574_v12 = vrot.slane %v573_v11, 1 }
 0x32e   : >> { %v575_v16 = vadd.f32 %v574_v12, %v573_v11 }
 0x330   : >> { %1338 = vlog2.f32 %v575_v16 }
 0x331   : >> { %1340 = vrcp.f32 %v575_v16 }
 0x33d   : >> { %v1339_v20 = vpop.eup %1338 }
 0x33e   : >> { %v1341_v21 = vpop.eup %1340  ;;  %v577_v22 = vmul.f32 0.6931472, %v1339_v20 }
 0x33f   : >> { %v624_v24 = vmul.f32 %v1341_v21, %v1337_v59 }
 0x340   : >> { %v586_v25 = vsub.f32 %v577_v22, %v585_v23 }
 0x341   : >> { %v625_v26 = vsub.f32 %v624_v24, %v1776_v40 }
 0x342   : >> { %v587_v27 = vmul.f32 %v1731_v8, %v586_v25 }
 0x343   : >> { %v626_v28 = vmul.f32 0.125, %v625_v26 }
 0x344   : >> { %v588_v29 = vsel %vm424_vm8, %v587_v27, 0.0 }
 0x345   : >> { %589 = vadd.xlane.f32.xlu1 %v588_v29  ;;  %v627_v30 = vpack.c.bf16 %v626_v28, %v626_v28 }
 0x347   : >> { %1191 = vmatmul.mubr.msk.bf16.vlgmr.msra.gmra.mxu0 %vm465_vm9, %v627_v30 }
 0x348   : >> { %1201 = vmatpush3.bf16.msra.mxu0 %v1760_v14  ;;  %1202 = vmatprep.mubr.msk.bf16.mxu0 %vm1568_vm1, %v1567_v9 }
 0x3ae   : >> { %v614_v32 = vpop.xlane.xlu1 %613 }
 0x3af   : >> { %v615_v33 = vrot.slane %v614_v32, 4 }
 0x3b1   : >> { %v616_v34 = vadd.f32 %v615_v33, %v614_v32 }
 0x3b3   : >> { %v617_v35 = vrot.slane %v616_v34, 2 }
 0x3b5   : >> { %v618_v41 = vadd.f32 %v617_v35, %v616_v34 }
 0x3b7   : >> { %v619_v44 = vrot.slane %v618_v41, 1 }
 0x3b9   : >> { %v620_v47 = vadd.f32 %v619_v44, %v618_v41 }
 0x3ce   : >> { %v590_v36 = vpop.xlane.xlu1 %589 }
 0x3cf   : >> { %v591_v38 = vrot.slane %v590_v36, 4 }
 0x3d1   : >> { %v592_v39 = vadd.f32 %v591_v38, %v590_v36 }
 0x3d3   : >> { %v593_v42 = vrot.slane %v592_v39, 2 }
 0x3d5   : >> { %v594_v43 = vadd.f32 %v593_v42, %v592_v39 }
 0x3d7   : >> { %v595_v45 = vrot.slane %v594_v43, 1 }
 0x3d9   : >> { %v596_v46 = vadd.f32 %v595_v45, %v594_v43 }
 0x3db   : >> { %1216 = vpush %v596_v46 }
 0x3dc   : >> { %1218 = vpush %v620_v47 }
 0x407   : >> { %v665_v14 = vpop.f32.mrf.mxu0 }
 0x408   : >> { %v671_v48 = vmul.f32 0.05, %v665_v14 }
 0x409   : >> { %v1192_v49 = vpop.f32.mrf.mxu0 }
 0x40a   : >> { %v1821_v50 = vsub.f32 %v1794_v31, %v671_v48 }
 0x40b   : >> { %v668_v51 = vpop.f32.mrf.mxu0 }
 0x40c   : >> { %v673_v52 = vpack.c.bf16 %v1821_v50, %v1821_v50  ;;  %s1217_s5 = spop %1216 }
 0x40d   : >> { %v1193_v53 = vpop.f32.mrf.mxu0  ;;  %s1219_s10 = spop %1218  ;;  %s598_s15 = smul.f32 0.125, %s1217_s5 }
 0x40e   : >> { %1197 = vmatmul.mubr.msk.bf16.vlgmr.msra.gmra.mxu1 %vm347_vm2, %v673_v52  ;;  %s622_s7 = smul.f32 0.125, %s1219_s10 }
 0x40f   : >> { %1207 = vmatpush3.bf16.xpose.msra.mxu1 %v1750_v13  ;;  %1208 = vmatprep.mubr.msk.bf16.mxu1 %vm1568_vm1, %v1567_v9  ;;  %vm944_vm1 = vcmp.eq.s32.totalorder %v1726_v4, 1 }
 0x4ce   : >> { %v711_v54 = vpop.f32.mrf.mxu1 }
 0x4cf   : >> { %v717_v55 = vsel %vm394_vm4, %v711_v54, -inf }
 0x4d0   : >> { %v718_v56 = vrot.slane %v717_v55, 4  ;;  %v1198_v57 = vpop.f32.mrf.mxu1 }
 0x4d2   : >> { %v719_v58 = vmax.f32 %v717_v55, %v718_v56  ;;  %v714_v31 = vpop.f32.mrf.mxu1 }
 0x4d4   : >> { %v720_v59 = vrot.slane %v719_v58, 2  ;;  %v1199_v60 = vpop.f32.mrf.mxu1 }
 0x4d6   : >> { %v721_v61 = vmax.f32 %v719_v58, %v720_v59 }
 0x4d8   : >> { %v722_v62 = vrot.slane %v721_v61, 1 }
 0x4da   : >> { %v723_v63 = vmax.f32 %v721_v61, %v722_v62 }
 0x4dc   : >> { %v724_v0 = vsub.f32 %v711_v54, %v723_v63  ;;  %vm757_vm12 = vcmp.ge.f32.partialorder %v711_v54, %v723_v63 }
 0x4dd   : >> { %v758_v2 = vsel %vm757_vm12, %v1729_v6, 8.0 }
 0x4de   : >> { %v725_v13 = vmul.f32 1.442695, %v724_v0  ;;  %v759_v5 = vsel %vm394_vm4, %v758_v2, inf  ;;  %v736_v20 = vmul.f32 %v1776_v40, %v724_v0 }
 0x4df   : >> { %v760_v7 = vrot.slane %v759_v5, 4 }
 0x4e0   : >> { %1342 = vpow2.f32 %v725_v13  ;;  %v737_v25 = vsel %vm394_vm4, %v736_v20, 0.0 }
 0x4e1   : >> { %v761_v10 = vmin.f32 %v759_v5, %v760_v7  ;;  %v738_v27 = vrot.slane %v737_v25, 4 }
 0x4e3   : >> { %v762_v11 = vrot.slane %v761_v10, 2  ;;  %v739_v30 = vadd.f32 %v738_v27, %v737_v25 }
 0x4e5   : >> { %v763_v12 = vmin.f32 %v761_v10, %v762_v11  ;;  %v740_v33 = vrot.slane %v739_v30, 2 }
 0x4e7   : >> { %v764_v15 = vrot.slane %v763_v12, 1  ;;  %v741_v34 = vadd.f32 %v740_v33, %v739_v30 }
 0x4e9   : >> { %v765_v16 = vmin.f32 %v763_v12, %v764_v15  ;;  %v742_v35 = vrot.slane %v741_v34, 1 }
 0x4eb   : >> { %vm766_vm13 = vcmp.eq.f32.partialorder %v765_v16, %v1772_v37  ;;  %v743_v41 = vadd.f32 %v742_v35, %v741_v34 }
 0x4ec   : >> { %v1140_v17 = vsel %vm766_vm13, 1.0, %v1567_v9 }
 0x4ed   : >> { %v1343_v18 = vpop.eup %1342  ;;  %v769_v19 = vmul.f32 %v1140_v17, %v1731_v8 }
 0x4ee   : >> { %v727_v21 = vsel %vm394_vm4, %v1343_v18, 0.0 }
 0x4ef   : >> { %v770_v22 = vsel %vm424_vm8, %v769_v19, 0.0  ;;  %v728_v23 = vrot.slane %v727_v21, 4 }
 0x4f0   : >> { %771 = vadd.xlane.f32.xlu1 %v770_v22 }
 0x4f1   : >> { %v729_v24 = vadd.f32 %v728_v23, %v727_v21 }
 0x4f3   : >> { %v730_v26 = vrot.slane %v729_v24, 2 }
 0x4f5   : >> { %v731_v28 = vadd.f32 %v730_v26, %v729_v24 }
 0x4f7   : >> { %v732_v29 = vrot.slane %v731_v28, 1 }
 0x4f9   : >> { %v733_v32 = vadd.f32 %v732_v29, %v731_v28 }
 0x4fb   : >> { %1344 = vlog2.f32 %v733_v32 }
 0x4fc   : >> { %1346 = vrcp.f32 %v733_v32 }
 0x508   : >> { %v1345_v36 = vpop.eup %1344 }
 0x509   : >> { %v1347_v38 = vpop.eup %1346  ;;  %v735_v39 = vmul.f32 0.6931472, %v1345_v36 }
 0x50a   : >> { %v782_v42 = vmul.f32 %v1347_v38, %v1343_v18 }
 0x50b   : >> { %v744_v43 = vsub.f32 %v735_v39, %v743_v41 }
 0x50c   : >> { %v783_v44 = vsub.f32 %v782_v42, %v1776_v40 }
 0x50d   : >> { %v745_v45 = vmul.f32 %v1731_v8, %v744_v43 }
 0x50e   : >> { %v784_v46 = vmul.f32 0.125, %v783_v44 }
 0x50f   : >> { %v746_v47 = vsel %vm424_vm8, %v745_v45, 0.0 }
 0x510   : >> { %747 = vadd.xlane.f32.xlu0 %v746_v47  ;;  %v785_v14 = vpack.c.bf16 %v784_v46, %v784_v46 }
 0x512   : >> { %1203 = vmatmul.mubr.msk.bf16.vlgmr.msra.gmra.mxu0 %vm465_vm9, %v785_v14 }
 0x579   : >> { %v772_v48 = vpop.xlane.xlu1 %771 }
 0x57a   : >> { %v773_v49 = vrot.slane %v772_v48, 4 }
 0x57c   : >> { %v774_v51 = vadd.f32 %v773_v49, %v772_v48 }
 0x57e   : >> { %v775_v52 = vrot.slane %v774_v51, 2 }
 0x580   : >> { %v776_v56 = vadd.f32 %v775_v52, %v774_v51 }
 0x582   : >> { %v777_v31 = vrot.slane %v776_v56, 1 }
 0x584   : >> { %v778_v61 = vadd.f32 %v777_v31, %v776_v56 }
 0x599   : >> { %v748_v53 = vpop.xlane.xlu0 %747 }
 0x59a   : >> { %v749_v54 = vrot.slane %v748_v53, 4 }
 0x59c   : >> { %v750_v55 = vadd.f32 %v749_v54, %v748_v53 }
 0x59e   : >> { %v751_v57 = vrot.slane %v750_v55, 2 }
 0x5a0   : >> { %v752_v58 = vadd.f32 %v751_v57, %v750_v55 }
 0x5a2   : >> { %v753_v59 = vrot.slane %v752_v58, 1 }
 0x5a4   : >> { %v754_v60 = vadd.f32 %v753_v59, %v752_v58 }
 0x5a6   : >> { %1220 = vpush %v754_v60 }
 0x5a7   : >> { %1222 = vpush %v778_v61 }
 0x5d2   : >> { %v823_v62 = vpop.f32.mrf.mxu0 }
 0x5d3   : >> { %v829_v63 = vmul.f32 0.05, %v823_v62 }
 0x5d4   : >> { %v1204_v0 = vpop.f32.mrf.mxu0 }
 0x5d5   : >> { %v830_v2 = vsub.f32 %v1821_v50, %v829_v63 }
 0x5d6   : >> { %v826_v13 = vpop.f32.mrf.mxu0 }
 0x5d7   : >> { %v831_v5 = vpack.c.bf16 %v830_v2, %v830_v2  ;;  %s1221_s13 = spop %1220 }
 0x5d8   : >> { %v1205_v7 = vpop.f32.mrf.mxu0  ;;  %s1223_s25 = spop %1222  ;;  %s756_s8 = smul.f32 0.125, %s1221_s13 }
 0x5d9   : >> { %1209 = vmatmul.mubr.msk.bf16.vlgmr.msra.gmra.mxu1 %vm347_vm2, %v831_v5  ;;  %s780_s6 = smul.f32 0.125, %s1223_s25  ;;  %vm949_vm2 = vcmp.eq.s32.totalorder %v1726_v4, 2 }
 0x699   : >> { %v869_v10 = vpop.f32.mrf.mxu1 }
 0x69a   : >> { %v875_v11 = vsel %vm394_vm4, %v869_v10, -inf }
 0x69b   : >> { %v876_v12 = vrot.slane %v875_v11, 4  ;;  %v1210_v15 = vpop.f32.mrf.mxu1 }
 0x69c   : >> { %v947_v15 = vstv %s622_s7 }
 0x69d   : >> { %v877_v16 = vmax.f32 %v875_v11, %v876_v12  ;;  %v872_v17 = vpop.f32.mrf.mxu1  ;;  %v942_v11 = vstv %s459_s27  ;;  %v945_v12 = vstv %s598_s15 }
 0x69f   : >> { %v878_v18 = vrot.slane %v877_v16, 2  ;;  %v1211_v19 = vpop.f32.mrf.mxu1 }
 0x6a0   : >> { %v943_v19 = vsel %vm939_vm0, %v942_v11, 0.0 }
 0x6a1   : >> { %v879_v20 = vmax.f32 %v877_v16, %v878_v18  ;;  %v950_v16 = vstv %s756_s8  ;;  %v952_v18 = vstv %s780_s6 }
 0x6a3   : >> { %v880_v21 = vrot.slane %v879_v20, 1 }
 0x6a5   : >> { %v881_v22 = vmax.f32 %v879_v20, %v880_v21  ;;  %v959_v21 = vld [vmem:[#allocation8] sm:$0xff] }
 0x6a7   : >> { %v882_v23 = vsub.f32 %v869_v10, %v881_v22  ;;  %vm915_vm14 = vcmp.ge.f32.partialorder %v869_v10, %v881_v22  ;;  %v940_v10 = vstv %s435_s22  ;;  %v948_v22 = vsel %vm944_vm1, %v947_v15, %v943_v19 }
 0x6a8   : >> { %v916_v50 = vsel %vm915_vm14, %v1729_v6, 8.0  ;;  %v941_v17 = vsel %vm939_vm0, %v940_v10, 0.0 }
 0x6a9   : >> { %v883_v24 = vmul.f32 1.442695, %v882_v23  ;;  %v917_v25 = vsel %vm394_vm4, %v916_v50, inf  ;;  %v894_v36 = vmul.f32 %v1776_v40, %v882_v23  ;;  %v946_v20 = vsel %vm944_vm1, %v945_v12, %v941_v17 }
 0x6aa   : >> { %v918_v26 = vrot.slane %v917_v25, 4  ;;  %v951_v23 = vsel %vm949_vm2, %v950_v16, %v946_v20 }
 0x6ab   : >> { %1348 = vpow2.f32 %v883_v24  ;;  %v895_v43 = vsel %vm394_vm4, %v894_v36, 0.0  ;;  %v962_v24 = vld [vmem:[#allocation9] sm:$0xff] }
 0x6ac   : >> { %v919_v27 = vmin.f32 %v917_v25, %v918_v26  ;;  %v896_v45 = vrot.slane %v895_v43, 4  ;;  %v953_v25 = vsel %vm949_vm2, %v952_v18, %v948_v22 }
 0x6ae   : >> { %v920_v28 = vrot.slane %v919_v27, 2  ;;  %v897_v47 = vadd.f32 %v896_v45, %v895_v43 }
 0x6b0   : >> { %v921_v29 = vmin.f32 %v919_v27, %v920_v28  ;;  %v898_v14 = vrot.slane %v897_v47, 2 }
 0x6b2   : >> { %v922_v30 = vrot.slane %v921_v29, 1  ;;  %v899_v48 = vadd.f32 %v898_v14, %v897_v47 }
 0x6b4   : >> { %v923_v32 = vmin.f32 %v921_v29, %v922_v30  ;;  %v900_v49 = vrot.slane %v899_v48, 1 }
 0x6b6   : >> { %vm924_vm15 = vcmp.eq.f32.partialorder %v923_v32, %v1772_v37  ;;  %v901_v52 = vadd.f32 %v900_v49, %v899_v48 }
 0x6b7   : >> { %v1143_v33 = vsel %vm924_vm15, 1.0, %v1567_v9 }
 0x6b8   : >> { %v1349_v34 = vpop.eup %1348  ;;  %v927_v35 = vmul.f32 %v1143_v33, %v1731_v8 }
 0x6b9   : >> { %v885_v38 = vsel %vm394_vm4, %v1349_v34, 0.0 }
 0x6ba   : >> { %v928_v39 = vsel %vm424_vm8, %v927_v35, 0.0  ;;  %v886_v41 = vrot.slane %v885_v38, 4 }
 0x6bb   : >> { %929 = vadd.xlane.f32.xlu1 %v928_v39 }
 0x6bc   : >> { %v887_v42 = vadd.f32 %v886_v41, %v885_v38 }
 0x6be   : >> { %v888_v44 = vrot.slane %v887_v42, 2 }
 0x6c0   : >> { %v889_v46 = vadd.f32 %v888_v44, %v887_v42 }
 0x6c2   : >> { %v890_v37 = vrot.slane %v889_v46, 1 }
 0x6c4   : >> { %v891_v9 = vadd.f32 %v890_v37, %v889_v46 }
 0x6c6   : >> { %1350 = vlog2.f32 %v891_v9 }
 0x6d3   : >> { %v1351_v40 = vpop.eup %1350 }
 0x6d4   : >> { %v893_v51 = vmul.f32 0.6931472, %v1351_v40 }
 0x6d6   : >> { %v902_v53 = vsub.f32 %v893_v51, %v901_v52 }
 0x6d8   : >> { %v903_v54 = vmul.f32 %v1731_v8, %v902_v53 }
 0x6da   : >> { %v904_v55 = vsel %vm424_vm8, %v903_v54, 0.0 }
 0x6db   : >> { %905 = vadd.xlane.f32.xlu0 %v904_v55 }
 0x744   : >> { %v930_v56 = vpop.xlane.xlu1 %929 }
 0x745   : >> { %v931_v57 = vrot.slane %v930_v56, 4 }
 0x747   : >> { %v932_v58 = vadd.f32 %v931_v57, %v930_v56 }
 0x749   : >> { %v933_v31 = vrot.slane %v932_v58, 2 }
 0x74b   : >> { %v934_v62 = vadd.f32 %v933_v31, %v932_v58 }
 0x74d   : >> { %v935_v2 = vrot.slane %v934_v62, 1 }
 0x74f   : >> { %v936_v7 = vadd.f32 %v935_v2, %v934_v62 }
 0x764   : >> { %v906_v59 = vpop.xlane.xlu0 %905 }
 0x765   : >> { %v907_v60 = vrot.slane %v906_v59, 4 }
 0x767   : >> { %v908_v61 = vadd.f32 %v907_v60, %v906_v59 }
 0x769   : >> { %v909_v63 = vrot.slane %v908_v61, 2 }
 0x76b   : >> { %v910_v0 = vadd.f32 %v909_v63, %v908_v61 }
 0x76d   : >> { %v911_v13 = vrot.slane %v910_v0, 1 }
 0x76f   : >> { %v912_v5 = vadd.f32 %v911_v13, %v910_v0 }
 0x771   : >> { %1224 = vpush %v912_v5 }
 0x772   : >> { %1226 = vpush %v936_v7 }
 0x7a2   : >> { %s1225_s28 = spop %1224 }
 0x7a3   : >> { %s914_s0 = smul.f32 0.125, %s1225_s28  ;;  %s1227_s24 = spop %1226 }
 0x7a4   : >> { %s938_s12 = smul.f32 0.125, %s1227_s24 }
 0x7a5   : >> { %v955_v50 = vstv %s914_s0 }
 0x7a6   : >> { %v956_v26 = vsel %vm954_vm3, %v955_v50, %v951_v23  ;;  %v957_v27 = vstv %s938_s12  ;;  %326 = sbr.rel (!%p323_p2) target bundleno = 107 (0x6b), region = 109 }
 0x7a7   : >> { %v960_v28 = vadd.f32 %v959_v21, %v956_v26  ;;  %v958_v29 = vsel %vm954_vm3, %v957_v27, %v953_v25 }
 0x7a8   : >> { %v963_v30 = vadd.f32 %v962_v24, %v958_v29 }
 0x7a9   : >> { %961 = vst [vmem:[#allocation8] sm:$0xff] %v960_v28 }
 0x7aa   : >> { %964 = vst [vmem:[#allocation9] sm:$0xff] %v963_v30 }
 0x7ab PF: > { %p1258_p5 = scmp.eq.s32.totalorder %s1625_s21, 1  ;;  %s1569_s14 = smov [#allocation8]  }
 0x7ac   : > { %s974_s26 = sshll.u32 %s1569_s14, 4  ;;  %s1570_s29 = smov [#allocation9]   ;;  %s975_s26 = int_to_ptr.vmem [resolvable:$true] %s974_s26 }
 0x7ad   : > { %s987_s30 = sshll.u32 %s1570_s29, 4  ;;  %s1434_s5 = scalar_lea.vmem %s975_s26, 128  ;;  %s988_s30 = int_to_ptr.vmem [resolvable:$true] %s987_s30 }
 0x7ae   : > { %p1435_p7 = scmp.ne.s32.totalorder %s975_s26, %s1434_s5  ;;  %p1441_p9 = scmp.lt.s32.totalorder %s975_s26, %s975_s26 }
 0x7af   : > { %p1442_p10 = scmp.lt.s32.totalorder %s1434_s5, %s1434_s5 }
 0x7b0   : > { %p1436_p4 = pnand %p1435_p7, %p1258_p5 }
 0x7b1   : > { %p1443_p11 = por %p1442_p10, %p1441_p9 }
 0x7b2   : > { %p1437_p6 = pneg %p1436_p4 }
 0x7b4   : > { %p1444_p13 = pnand %p1443_p11, %p1437_p6 }
 0x7b6   : > { %1447 = shalt.err (!%p1444_p13)
}
 0x7b7   : > { %1237 = dma.vmem_to_hbm [thread:$0]  (%p1258_p5), %s975_s26, 128, %s1913_s3, [#allocation4]  }
 0x7b8   : > { %s1458_s23 = scalar_lea.vmem %s988_s30, 128  ;;  %p1465_p0 = scmp.lt.s32.totalorder %s988_s30, %s988_s30 }
 0x7b9   : > { %p1459_p8 = scmp.ne.s32.totalorder %s988_s30, %s1458_s23  ;;  %p1466_p1 = scmp.lt.s32.totalorder %s1458_s23, %s1458_s23 }
 0x7bb   : > { %p1460_p12 = pnand %p1459_p8, %p1258_p5  ;;  %p1467_p2 = por %p1466_p1, %p1465_p0 }
 0x7bd   : > { %p1461_p3 = pneg %p1460_p12 }
 0x7bf   : > { %p1468_p7 = pnand %p1467_p2, %p1461_p3 }
 0x7c1   : > { %1471 = shalt.err (!%p1468_p7)
}
 0x7c2   : > { %1239 = dma.vmem_to_hbm [thread:$0]  (%p1258_p5), %s988_s30, 128, %s1914_s4, [#allocation10]  }
 0x7c3   : > { %1523 = dma.done.wait (%p1258_p5), [#allocation4], 128  }
 0x7c4   : > { %1525 = vsyncadd (%p1258_p5), [#allocation4], 4294967168 }
 0x7c5   : > { %1527 = dma.done.wait (%p1258_p5), [#allocation10], 128  }
 0x7c6   : > { %1529 = vsyncadd (%p1258_p5), [#allocation10], 4294967168 }
 0x7c7 PF: > { %s23_s20 = sadd.s32 1, %s1552_s20   ;;  %s1929_s22 = sld [smem:[#allocation16_spill]] }
 0x7c8   : > { %p20_p4 = scmp.ge.s32.totalorder %s23_s20, 4   ;;  %s1930_s15 = smov %s1536_s16 }
 0x7c9   : > { %s1931_s16 = smov %s1540_s17  ;;  %s1932_s17 = smov %s1687_s9 }
 0x7ca   : > { %s1933_s18 = smov %s1548_s19  ;;  %22 = sbr.rel (!%p20_p4) target bundleno = 11 (0xb), region = 120 }
 0x7cd   : > { %s1934_s19 = smov %s1929_s22 }
 0x7cf   :  { %1004 = vsyncpa [#allocation3], 1 }
 0x7d0   :  { %1006 = vsyncpa [#allocation3 + $0x1], 1 }
 0x7d1   :  { %1007 = vsyncpa [#allocation6], 1 }
 0x7d2   :  { %1009 = vsyncpa [#allocation6 + $0x1], 1 }
 0x7d3   :  { %1010 = vsyncpa [#allocation4], 1 }
 0x7d4   :  { %1012 = vsyncpa [#allocation4 + $0x1], 1 }
 0x7d5   :  { %1013 = vsyncpa [#allocation10], 1 }

</bundles_post_ra>
